<compile_context>
chip_gen: v7x
topology: tpu7x:2x2x1
jax: 0.10.0
libtpu: 0.0.40
codegen_flags: <defaults>
</compile_context>

<pallas_src>
import functools
import math

import jax
import jax.numpy as jnp
from jax.experimental import pallas as pl
from jax.experimental.pallas import tpu as pltpu

EXPANSION = 4          # Bottleneck.expansion
BLU = 1.5              # quant_params default .blu -> forward_blu clamps to [0, 1.5]
BN_EPS = 1e-5


def _tpu_kind():
    try:
        return jax.devices()[0].device_kind.lower()
    except Exception:
        return ""


_KIND = _tpu_kind()
if ("v5" in _KIND) or ("v6" in _KIND):
    # v5e / v6e have 128 MiB physical VMEM per TensorCore -> roomier budgets.
    VMEM_LIMIT = 100 * 1024 * 1024
    MM_BUDGET = 48 * 1024 * 1024
else:
    # v7x has 64 MiB / TC; also the safe default for unknown chips.
    VMEM_LIMIT = 48 * 1024 * 1024
    MM_BUDGET = 16 * 1024 * 1024


def _compiler_params(n_parallel_axes=1):
    return pltpu.CompilerParams(
        dimension_semantics=("parallel",) * n_parallel_axes,
        vmem_limit_bytes=VMEM_LIMIT)


def _round_up(x, m):
    return ((x + m - 1) // m) * m


# -----------------------------------------------------------------------------
# Pallas kernels
# -----------------------------------------------------------------------------
def _fused_mm_kernel(*refs, n_mm, has_residual, clamp_max):
    """refs = (x_0, w_0, ..., x_{n-1}, w_{n-1}, shift, [residual], out).

    out = clamp( sum_i x_i @ w_i + shift [+ residual], 0, clamp_max )
    x_i: [tm, K_i] bf16, w_i: [K_i, N] bf16, shift: [1, N] f32,
    residual: [tm, N] bf16, out: [tm, N] bf16.  Accumulation in f32.
    """
    o_ref = refs[-1]
    acc = jnp.dot(refs[0][...], refs[1][...], preferred_element_type=jnp.float32)
    for i in range(1, n_mm):
        acc += jnp.dot(refs[2 * i][...], refs[2 * i + 1][...],
                       preferred_element_type=jnp.float32)
    acc += refs[2 * n_mm][...]                     # per-channel folded-BN shift (f32)
    if has_residual:
        acc += refs[2 * n_mm + 1][...].astype(jnp.float32)
    if clamp_max is not None:
        acc = jnp.clip(acc, 0.0, clamp_max)
    o_ref[...] = acc.astype(o_ref.dtype)


def _conv3x3_kernel(*refs, taps, th, wo, clamp_max):
    """Direct 3x3 conv for one (image, output-row-block) grid step.

    refs = (slab_0[, slab_1], w, shift, out)
      slab_s: [1, Hs, Wo, 3*Cin] bf16  dx-packed padded activation (resident per image)
      w:      [3, 3*Cin, Cout]   bf16  per-dy weights (BN scale pre-folded, dx-major K)
      shift:  [1, Cout]          f32
      out:    [1, th, Wo, Cout]  bf16  one row block
    taps[dy] = (slab_index, row_offset): output row r reads slab row r + row_offset.
    All slab slices are along the leading H dim only -> pure views, no relayout.
    """
    n_slabs = len(refs) - 3
    w_ref, b_ref, o_ref = refs[n_slabs], refs[n_slabs + 1], refs[n_slabs + 2]
    cout = o_ref.shape[3]
    k3 = w_ref.shape[1]
    row0 = pl.program_id(1) * th                      # first output row of this block
    acc = None
    for dy, (si, off) in enumerate(taps):
        xs = refs[si][0, pl.ds(row0 + off, th), :, :]           # [th, Wo, 3*Cin]
        part = jnp.dot(xs.reshape(th * wo, k3), w_ref[dy],
                       preferred_element_type=jnp.float32)
        acc = part if acc is None else acc + part
    acc += b_ref[...]
    if clamp_max is not None:
        acc = jnp.clip(acc, 0.0, clamp_max)
    o_ref[...] = acc.reshape(1, th, wo, cout).astype(o_ref.dtype)


# -----------------------------------------------------------------------------
# Pallas wrappers
# -----------------------------------------------------------------------------
def _pick_tm(m, ks, n_cols, budget):
    """Largest power-of-two row tile (<= 512) whose working set fits the budget,
    then capped so the grid keeps >=4 steps when M allows (megacore/pipelining)."""
    tm = 512
    while tm > 64:
        need = sum(2 * 2 * tm * k for k in ks)        # bf16 x tiles, double-buffered
        need += sum(2 * 2 * k * n_cols for k in ks)   # bf16 weights (2 pipeline bufs)
        need += 3 * 2 * tm * n_cols                   # bf16 out + residual buffers
        need += 4 * tm * n_cols                       # f32 accumulator
        if need <= budget:
            break
        tm //= 2
    if m > 256:
        tm = min(tm, max(128, _round_up(pl.cdiv(m, 8), 8)))
    return min(tm, m)


def fused_matmul(operands, shift, residual=None, clamp_max=None):
    """clamp( sum_i x_i @ w_i + shift [+ residual], 0, clamp_max ) -> bf16 [M, N].

    operands: list of (x_i [M, K_i] bf16, w_i [K_i, N] bf16);  shift: [1, N] f32.
    Row-tiled over M with a parallel grid; weights stay resident in VMEM; no HBM
    padding of M (cdiv grid handles a partial last tile).
    """
    m = operands[0][0].shape[0]
    n_cols = operands[0][1].shape[1]
    ks = [x.shape[1] for x, _ in operands]
    tm = _pick_tm(m, ks, n_cols, MM_BUDGET)
    args, in_specs = [], []
    for x, w in operands:
        k = x.shape[1]
        args += [x, w]
        in_specs += [pl.BlockSpec((tm, k), lambda i: (i, 0)),
                     pl.BlockSpec((k, n_cols), lambda i: (0, 0))]
    args.append(shift)
    in_specs.append(pl.BlockSpec((1, n_cols), lambda i: (0, 0)))
    if residual is not None:
        args.append(residual)
        in_specs.append(pl.BlockSpec((tm, n_cols), lambda i: (i, 0)))
    flops = 2 * m * sum(ks) * n_cols
    bytes_accessed = (sum(m * k + k * n_cols for k in ks) + m * n_cols
                      + (m * n_cols if residual is not None else 0)) * 2 + n_cols * 4
    return pl.pallas_call(
        functools.partial(_fused_mm_kernel, n_mm=len(operands),
                          has_residual=residual is not None, clamp_max=clamp_max),
        out_shape=jax.ShapeDtypeStruct((m, n_cols), jnp.bfloat16),
        grid=(pl.cdiv(m, tm),),
        in_specs=in_specs,
        out_specs=pl.BlockSpec((tm, n_cols), lambda i: (i, 0)),
        compiler_params=_compiler_params(1),
        cost_estimate=pl.CostEstimate(flops=flops, transcendentals=0,
                                      bytes_accessed=bytes_accessed),
    )(*args)


def _pick_row_tile(ho, wo, cout):
    """Output-row tile: bound the f32 accumulator (~<=512 KiB) and prefer >=2
    row blocks (deeper parallel grid); always an exact divisor of ho."""
    max_rows = max(1, (512 * 1024) // (4 * cout * max(wo, 1)))
    th = min(ho, max_rows)
    if th == ho and ho > 1:
        th = pl.cdiv(ho, 2)
    while ho % th:
        th -= 1
    return th


def conv3x3_bn_clamp(x, p, stride, clamp_max):
    """Conv2d(3x3, stride, padding=1, bias=False) + folded BN + clamp(0, clamp_max).

    The wrapper packs the 3 dx taps along the channel/K axis (bf16), so the kernel
    only slices the leading H dim and runs 3 MXU matmuls with K = 3*Cin per output
    row block.  XLA fuses the pad into the packing concat, so the conv2 input is
    materialized once (at 3x width of the planes-narrow activation).
    """
    n, h, w, cin = x.shape
    cout = p["w"].shape[-1]
    ho, wo = h // stride, w // stride
    xp = jnp.pad(x, ((0, 0), (1, 1), (1, 1), (0, 0)))           # bf16
    if stride == 1:
        slabs = [jnp.concatenate([xp[:, :, dx:dx + wo, :] for dx in range(3)],
                                 axis=-1)]                      # [N, H+2, Wo, 3C]
        taps = ((0, 0), (0, 1), (0, 2))                         # dy -> (slab, row off)
    else:
        assert stride == 2 and h % 2 == 0 and w % 2 == 0

        def pack(py):   # row parity py of the padded input, dx-packed columns
            return jnp.concatenate(
                [xp[:, py::2, dx:dx + 2 * wo:2, :] for dx in range(3)], axis=-1)

        slabs = [pack(0), pack(1)]                              # [N, Ho+1, Wo, 3C] each
        taps = ((0, 0), (1, 0), (0, 1))                         # dy = 0, 1, 2

    th = _pick_row_tile(ho, wo, cout)
    nb = ho // th
    in_specs = [pl.BlockSpec((1,) + s.shape[1:], lambda i, j: (i, 0, 0, 0))
                for s in slabs]
    in_specs += [pl.BlockSpec(p["w"].shape, lambda i, j: (0, 0, 0)),
                 pl.BlockSpec((1, cout), lambda i, j: (0, 0))]
    flops = 2 * n * ho * wo * 9 * cin * cout
    bytes_accessed = ((sum(s.size for s in slabs) + p["w"].size) * 2
                      + cout * 4 + n * ho * wo * cout * 2)
    return pl.pallas_call(
        functools.partial(_conv3x3_kernel, taps=taps, th=th, wo=wo,
                          clamp_max=clamp_max),
        out_shape=jax.ShapeDtypeStruct((n, ho, wo, cout), jnp.bfloat16),
        grid=(n, nb),
        in_specs=in_specs,
        out_specs=pl.BlockSpec((1, th, wo, cout), lambda i, j: (i, j, 0, 0)),
        compiler_params=_compiler_params(2),
        cost_estimate=pl.CostEstimate(flops=flops, transcendentals=0,
                                      bytes_accessed=bytes_accessed),
    )(*slabs, p["w"], p["shift"])


# -----------------------------------------------------------------------------
# Parameter construction (deterministic; matches the module's init scheme)
# -----------------------------------------------------------------------------
def make_conv_bn(key, cin, cout, k):
    """Conv2d(kxk, bias=False) + BatchNorm2d(cout) in inference mode, folded.

    Weight ~ N(0, sqrt(2/n)) with n = k*k*cout.  BN with freshly-initialized
    statistics (gamma=1, beta=0, mean=0, var=1, eps=1e-5): the per-channel scale
    is folded into the weight columns; only the per-channel shift remains.
    3x3 weights are stored [3, 3*Cin, Cout] with a dx-major K axis (matches the
    wrapper-side dx packing of the activation).
    """
    n_fan = k * k * cout
    w = jax.random.normal(key, (cout, cin, k, k), jnp.float32) * math.sqrt(2.0 / n_fan)
    gamma = jnp.ones((cout,), jnp.float32)
    beta = jnp.zeros((cout,), jnp.float32)
    mean = jnp.zeros((cout,), jnp.float32)
    var = jnp.ones((cout,), jnp.float32)
    scale = gamma / jnp.sqrt(var + BN_EPS)
    shift = (beta - mean * scale).reshape(1, cout)
    w = w * scale[:, None, None, None]                       # fold BN scale into W
    if k == 1:
        w_mat = jnp.transpose(w[:, :, 0, 0], (1, 0))                       # [Cin, Cout]
    else:
        w_mat = jnp.transpose(w, (2, 3, 1, 0)).reshape(k, k * cin, cout)   # [3,3Cin,Cout]
    return {"w": w_mat.astype(jnp.bfloat16), "shift": shift, "k": k}


def make_bottleneck(key, inplanes, planes, stride=1):
    ks = jax.random.split(key, 4)
    blk = {
        "conv1": make_conv_bn(ks[0], inplanes, planes, 1),
        "conv2": make_conv_bn(ks[1], planes, planes, 3),
        "conv3": make_conv_bn(ks[2], planes, planes * EXPANSION, 1),
        "stride": stride,
        "downsample": None,
    }
    if stride != 1 or inplanes != planes * EXPANSION:
        blk["downsample"] = make_conv_bn(ks[3], inplanes, planes * EXPANSION, 1)
    return blk


# -----------------------------------------------------------------------------
# Forward (Bottleneck.forward_blu with the module's default blu = 1.5;
# Bottleneck.forward is the same graph with plain ReLU instead of the clamp)
# -----------------------------------------------------------------------------
def bottleneck_forward(x, blk):
    """x: [N, H, W, inplanes] bf16 (NHWC) -> [N, Ho, Wo, planes*4] bf16."""
    n, h, w, cin = x.shape
    stride = blk["stride"]
    planes = blk["conv1"]["w"].shape[1]
    cout = blk["conv3"]["w"].shape[1]

    # conv1 (1x1) + bn1 + clamp(0, blu)
    xf = x.reshape(n * h * w, cin)
    y1 = fused_matmul([(xf, blk["conv1"]["w"])], blk["conv1"]["shift"],
                      clamp_max=BLU)
    y1 = y1.reshape(n, h, w, planes)

    # conv2 (3x3, stride) + bn2 + clamp(0, blu)   -- direct conv, no im2col in HBM
    y2 = conv3x3_bn_clamp(y1, blk["conv2"], stride, BLU)
    ho, wo = y2.shape[1], y2.shape[2]
    y2f = y2.reshape(n * ho * wo, planes)

    # conv3 (1x1) + bn3  [+ downsample conv+bn]  + residual add + clamp, all fused
    if blk["downsample"] is None:
        out = fused_matmul([(y2f, blk["conv3"]["w"])], blk["conv3"]["shift"],
                           residual=xf, clamp_max=BLU)
    else:
        xd = x if stride == 1 else x[:, ::stride, ::stride, :]
        xdf = xd.reshape(n * ho * wo, cin)
        out = fused_matmul(
            [(y2f, blk["conv3"]["w"]), (xdf, blk["downsample"]["w"])],
            blk["conv3"]["shift"] + blk["downsample"]["shift"],
            clamp_max=BLU)
    return out.reshape(n, ho, wo, cout)


# -----------------------------------------------------------------------------
# Pure-JAX reference (for correctness checking of the Pallas path)
# -----------------------------------------------------------------------------
def _conv_bn_ref(x, p, stride, clamp_max):
    k = p["k"]
    if k == 1:
        wr = p["w"].astype(jnp.float32).reshape(1, 1, *p["w"].shape)
    else:
        k3, cout = p["w"].shape[1], p["w"].shape[2]
        wr = p["w"].astype(jnp.float32).reshape(3, 3, k3 // 3, cout)
    pad = k // 2
    y = jax.lax.conv_general_dilated(
        x.astype(jnp.float32), wr, window_strides=(stride, stride),
        padding=((pad, pad), (pad, pad)),
        dimension_numbers=("NHWC", "HWIO", "NHWC"),
        precision=jax.lax.Precision.HIGHEST)
    y = y + p["shift"].reshape(1, 1, 1, -1)
    if clamp_max is not None:
        y = jnp.clip(y, 0.0, clamp_max)
    return y


def bottleneck_ref(x, blk):
    xf = x.astype(jnp.float32)
    y = _conv_bn_ref(x, blk["conv1"], 1, BLU).astype(jnp.bfloat16)
    y = _conv_bn_ref(y, blk["conv2"], blk["stride"], BLU).astype(jnp.bfloat16)
    y = _conv_bn_ref(y, blk["conv3"], 1, None)
    if blk["downsample"] is None:
        res = xf
    else:
        res = _conv_bn_ref(x, blk["downsample"], blk["stride"], None)
    return jnp.clip(y + res, 0.0, BLU).astype(jnp.bfloat16)


# -----------------------------------------------------------------------------
if __name__ == "__main__":
    # TODO(synk): only the forward (inference) path is implemented; the module's
    # quantization bookkeeping (quant_params, quantize*/integer_model, n_sigma_of,
    # struct file I/O) is host-side state with no Pallas kernel equivalent.
    key = jax.random.PRNGKey(0)
    kp1, kp2, kx = jax.random.split(key, 3)

    # Small Bottleneck configs: a stride-2 block with downsample, followed by an
    # identity (stride-1, no-downsample) block, as in a ResNet stage.
    inplanes, planes = 64, 32
    blk1 = make_bottleneck(kp1, inplanes, planes, stride=2)             # downsample
    blk2 = make_bottleneck(kp2, planes * EXPANSION, planes, stride=1)   # identity

    x = jax.random.normal(kx, (2, inplanes, 16, 16), jnp.float32)       # NCHW input

    @jax.jit
    def fwd(x_nchw):
        h = jnp.transpose(x_nchw, (0, 2, 3, 1)).astype(jnp.bfloat16)    # NCHW->NHWC
        h = bottleneck_forward(h, blk1)
        h = bottleneck_forward(h, blk2)
        return jnp.transpose(h, (0, 3, 1, 2))                           # NHWC->NCHW

    @jax.jit
    def ref(x_nchw):
        h = jnp.transpose(x_nchw, (0, 2, 3, 1)).astype(jnp.bfloat16)
        h = bottleneck_ref(h, blk1)
        h = bottleneck_ref(h, blk2)
        return jnp.transpose(h, (0, 3, 1, 2))

    y = fwd(x)
    jax.block_until_ready(y)
    assert y.shape == (2, planes * EXPANSION, 8, 8), y.shape
    yf = y.astype(jnp.float32)
    assert bool(jnp.isfinite(yf).all())
    # forward_blu clamps every output to [0, blu]
    assert float(jnp.min(yf)) >= 0.0 and float(jnp.max(yf)) <= BLU + 1e-2
    # cross-check against the pure-JAX reference (same bf16 casts between stages)
    y_ref = jax.block_until_ready(ref(x)).astype(jnp.float32)
    err = float(jnp.max(jnp.abs(yf - y_ref)))
    assert err < 6e-2, f"max abs error vs reference: {err}"
    print("KERNEL_OK")
</pallas_src>

<mosaic_0001>
module attributes {stable_mosaic.version = 11 : i64} {
  func.func @_fused_mm_kernel(%arg0: i32, %arg1: memref<128x64xbf16, #tpu.memory_space<vmem>>, %arg2: memref<64x32xbf16, #tpu.memory_space<vmem>>, %arg3: memref<1x32xf32, #tpu.memory_space<vmem>>, %arg4: memref<128x32xbf16, #tpu.memory_space<vmem>>) attributes {dimension_semantics = [#tpu.dimension_semantics<parallel>], iteration_bounds = array<i64: 4>, scalar_prefetch = 0 : i64, scratch_operands = 0 : i64, tpu.core_type = #tpu.core_type<tc>, window_params = [{transform_indices = @transform_0, window_bounds = array<i64: 128, 64>}, {pipeline_mode = #tpu.pipeline_mode<synchronous>, transform_indices = @transform_1, window_bounds = array<i64: 64, 32>}, {pipeline_mode = #tpu.pipeline_mode<synchronous>, transform_indices = @transform_2, window_bounds = array<i64: 1, 32>}, {transform_indices = @transform_3, window_bounds = array<i64: 128, 32>}]} {
    %c0 = arith.constant 0 : index
    %c0_0 = arith.constant 0 : index
    %0 = vector.load %arg1[%c0, %c0_0] : memref<128x64xbf16, #tpu.memory_space<vmem>>, vector<128x64xbf16>
    %c0_1 = arith.constant 0 : index
    %c0_2 = arith.constant 0 : index
    %1 = vector.load %arg2[%c0_1, %c0_2] : memref<64x32xbf16, #tpu.memory_space<vmem>>, vector<64x32xbf16>
    %cst = arith.constant dense<0.000000e+00> : vector<128x32xf32>
    %2 = tpu.matmul %0, %1, %cst {dimension_numbers = #tpu.dot_dimension_numbers<[1], [0], [0], [1], [0, 0, 1, 1], [], []>} : vector<128x64xbf16>, vector<64x32xbf16>, vector<128x32xf32> -> vector<128x32xf32>
    %c0_3 = arith.constant 0 : index
    %c0_4 = arith.constant 0 : index
    %3 = vector.load %arg3[%c0_3, %c0_4] : memref<1x32xf32, #tpu.memory_space<vmem>>, vector<1x32xf32>
    %4 = vector.broadcast %3 : vector<1x32xf32> to vector<128x32xf32>
    %5 = arith.addf %2, %4 : vector<128x32xf32>
    %cst_5 = arith.constant 0.000000e+00 : f32
    %cst_6 = arith.constant 1.500000e+00 : f32
    %6 = vector.broadcast %cst_5 : f32 to vector<128x32xf32>
    %7 = arith.maximumf %6, %5 : vector<128x32xf32>
    %8 = vector.broadcast %cst_6 : f32 to vector<128x32xf32>
    %9 = arith.minimumf %8, %7 : vector<128x32xf32>
    %10 = arith.truncf %9 : vector<128x32xf32> to vector<128x32xbf16>
    %c0_7 = arith.constant 0 : index
    %c0_8 = arith.constant 0 : index
    %11 = vector.load %arg4[%c0_7, %c0_8] : memref<128x32xbf16, #tpu.memory_space<vmem>>, vector<128x32xbf16>
    tpu.vector_store %arg4[%c0_7, %c0_8], %10 {strides = array<i32>} : memref<128x32xbf16, #tpu.memory_space<vmem>>, vector<128x32xbf16>,
    return
  }
  func.func @transform_0(%arg0: i32) -> (i32, i32) {
    %c0_i32 = arith.constant 0 : i32
    %c0_i32_0 = arith.constant 0 : i32
    return %arg0, %c0_i32 : i32, i32
  }
  func.func @transform_1(%arg0: i32) -> (i32, i32) {
    %c0_i32 = arith.constant 0 : i32
    %c0_i32_0 = arith.constant 0 : i32
    %c0_i32_1 = arith.constant 0 : i32
    return %c0_i32, %c0_i32_0 : i32, i32
  }
  func.func @transform_2(%arg0: i32) -> (i32, i32) {
    %c0_i32 = arith.constant 0 : i32
    %c0_i32_0 = arith.constant 0 : i32
    %c0_i32_1 = arith.constant 0 : i32
    return %c0_i32, %c0_i32_0 : i32, i32
  }
  func.func @transform_3(%arg0: i32) -> (i32, i32) {
    %c0_i32 = arith.constant 0 : i32
    %c0_i32_0 = arith.constant 0 : i32
    return %arg0, %c0_i32 : i32, i32
  }
}

module attributes {stable_mosaic.version = 11 : i64} {
  func.func @_conv3x3_kernel(%arg0: i32, %arg1: i32, %arg2: memref<1x9x8x96xbf16, #tpu.memory_space<vmem>>, %arg3: memref<1x9x8x96xbf16, #tpu.memory_space<vmem>>, %arg4: memref<3x96x32xbf16, #tpu.memory_space<vmem>>, %arg5: memref<1x32xf32, #tpu.memory_space<vmem>>, %arg6: memref<1x4x8x32xbf16, #tpu.memory_space<vmem>>) attributes {dimension_semantics = [#tpu.dimension_semantics<parallel>, #tpu.dimension_semantics<parallel>], iteration_bounds = array<i64: 2, 2>, scalar_prefetch = 0 : i64, scratch_operands = 0 : i64, tpu.core_type = #tpu.core_type<tc>, window_params = [{transform_indices = @transform_0, window_bounds = array<i64: 1, 9, 8, 96>}, {transform_indices = @transform_1, window_bounds = array<i64: 1, 9, 8, 96>}, {pipeline_mode = #tpu.pipeline_mode<synchronous>, transform_indices = @transform_2, window_bounds = array<i64: 3, 96, 32>}, {pipeline_mode = #tpu.pipeline_mode<synchronous>, transform_indices = @transform_3, window_bounds = array<i64: 1, 32>}, {transform_indices = @transform_4, window_bounds = array<i64: 1, 4, 8, 32>}]} {
    %c4_i32 = arith.constant 4 : i32
    %0 = arith.muli %arg1, %c4_i32 : i32
    %c0_i32 = arith.constant 0 : i32
    %1 = arith.addi %0, %c0_i32 : i32
    %c0 = arith.constant 0 : index
    %2 = arith.index_cast %1 : i32 to index
    %c0_0 = arith.constant 0 : index
    %c0_1 = arith.constant 0 : index
    %3 = vector.load %arg2[%c0, %2, %c0_0, %c0_1] : memref<1x9x8x96xbf16, #tpu.memory_space<vmem>>, vector<1x4x8x96xbf16>
    %4 = vector.shape_cast %3 : vector<1x4x8x96xbf16> to vector<4x8x96xbf16>
    %5 = vector.shape_cast %4 : vector<4x8x96xbf16> to vector<32x96xbf16>
    %c0_2 = arith.constant 0 : index
    %c0_3 = arith.constant 0 : index
    %c0_4 = arith.constant 0 : index
    %6 = vector.load %arg4[%c0_2, %c0_3, %c0_4] : memref<3x96x32xbf16, #tpu.memory_space<vmem>>, vector<1x96x32xbf16>
    %7 = vector.shape_cast %6 : vector<1x96x32xbf16> to vector<96x32xbf16>
    %cst = arith.constant dense<0.000000e+00> : vector<32x32xf32>
    %8 = tpu.matmul %5, %7, %cst {dimension_numbers = #tpu.dot_dimension_numbers<[1], [0], [0], [1], [0, 0, 1, 1], [], []>} : vector<32x96xbf16>, vector<96x32xbf16>, vector<32x32xf32> -> vector<32x32xf32>
    %c0_i32_5 = arith.constant 0 : i32
    %9 = arith.addi %0, %c0_i32_5 : i32
    %c0_6 = arith.constant 0 : index
    %10 = arith.index_cast %9 : i32 to index
    %c0_7 = arith.constant 0 : index
    %c0_8 = arith.constant 0 : index
    %11 = vector.load %arg3[%c0_6, %10, %c0_7, %c0_8] : memref<1x9x8x96xbf16, #tpu.memory_space<vmem>>, vector<1x4x8x96xbf16>
    %12 = vector.shape_cast %11 : vector<1x4x8x96xbf16> to vector<4x8x96xbf16>
    %13 = vector.shape_cast %12 : vector<4x8x96xbf16> to vector<32x96xbf16>
    %c1 = arith.constant 1 : index
    %c0_9 = arith.constant 0 : index
    %c0_10 = arith.constant 0 : index
    %14 = vector.load %arg4[%c1, %c0_9, %c0_10] : memref<3x96x32xbf16, #tpu.memory_space<vmem>>, vector<1x96x32xbf16>
    %15 = vector.shape_cast %14 : vector<1x96x32xbf16> to vector<96x32xbf16>
    %cst_11 = arith.constant dense<0.000000e+00> : vector<32x32xf32>
    %16 = tpu.matmul %13, %15, %cst_11 {dimension_numbers = #tpu.dot_dimension_numbers<[1], [0], [0], [1], [0, 0, 1, 1], [], []>} : vector<32x96xbf16>, vector<96x32xbf16>, vector<32x32xf32> -> vector<32x32xf32>
    %17 = arith.addf %8, %16 : vector<32x32xf32>
    %c1_i32 = arith.constant 1 : i32
    %18 = arith.addi %0, %c1_i32 : i32
    %c0_12 = arith.constant 0 : index
    %19 = arith.index_cast %18 : i32 to index
    %c0_13 = arith.constant 0 : index
    %c0_14 = arith.constant 0 : index
    %20 = vector.load %arg2[%c0_12, %19, %c0_13, %c0_14] : memref<1x9x8x96xbf16, #tpu.memory_space<vmem>>, vector<1x4x8x96xbf16>
    %21 = vector.shape_cast %20 : vector<1x4x8x96xbf16> to vector<4x8x96xbf16>
    %22 = vector.shape_cast %21 : vector<4x8x96xbf16> to vector<32x96xbf16>
    %c2 = arith.constant 2 : index
    %c0_15 = arith.constant 0 : index
    %c0_16 = arith.constant 0 : index
    %23 = vector.load %arg4[%c2, %c0_15, %c0_16] : memref<3x96x32xbf16, #tpu.memory_space<vmem>>, vector<1x96x32xbf16>
    %24 = vector.shape_cast %23 : vector<1x96x32xbf16> to vector<96x32xbf16>
    %cst_17 = arith.constant dense<0.000000e+00> : vector<32x32xf32>
    %25 = tpu.matmul %22, %24, %cst_17 {dimension_numbers = #tpu.dot_dimension_numbers<[1], [0], [0], [1], [0, 0, 1, 1], [], []>} : vector<32x96xbf16>, vector<96x32xbf16>, vector<32x32xf32> -> vector<32x32xf32>
    %26 = arith.addf %17, %25 : vector<32x32xf32>
    %c0_18 = arith.constant 0 : index
    %c0_19 = arith.constant 0 : index
    %27 = vector.load %arg5[%c0_18, %c0_19] : memref<1x32xf32, #tpu.memory_space<vmem>>, vector<1x32xf32>
    %28 = vector.broadcast %27 : vector<1x32xf32> to vector<32x32xf32>
    %29 = arith.addf %26, %28 : vector<32x32xf32>
    %cst_20 = arith.constant 0.000000e+00 : f32
    %cst_21 = arith.constant 1.500000e+00 : f32
    %30 = vector.broadcast %cst_20 : f32 to vector<32x32xf32>
    %31 = arith.maximumf %30, %29 : vector<32x32xf32>
    %32 = vector.broadcast %cst_21 : f32 to vector<32x32xf32>
    %33 = arith.minimumf %32, %31 : vector<32x32xf32>
    %34 = vector.shape_cast %33 : vector<32x32xf32> to vector<1x4x8x32xf32>
    %35 = arith.truncf %34 : vector<1x4x8x32xf32> to vector<1x4x8x32xbf16>
    %c0_22 = arith.constant 0 : index
    %c0_23 = arith.constant 0 : index
    %c0_24 = arith.constant 0 : index
    %c0_25 = arith.constant 0 : index
    %36 = vector.load %arg6[%c0_22, %c0_23, %c0_24, %c0_25] : memref<1x4x8x32xbf16, #tpu.memory_space<vmem>>, vector<1x4x8x32xbf16>
    tpu.vector_store %arg6[%c0_22, %c0_23, %c0_24, %c0_25], %35 {strides = array<i32>} : memref<1x4x8x32xbf16, #tpu.memory_space<vmem>>, vector<1x4x8x32xbf16>,
    return
  }
  func.func @transform_0(%arg0: i32, %arg1: i32) -> (i32, i32, i32, i32) {
    %c0_i32 = arith.constant 0 : i32
    %c0_i32_0 = arith.constant 0 : i32
    %c0_i32_1 = arith.constant 0 : i32
    %c0_i32_2 = arith.constant 0 : i32
    return %arg0, %c0_i32, %c0_i32_0, %c0_i32_1 : i32, i32, i32, i32
  }
  func.func @transform_1(%arg0: i32, %arg1: i32) -> (i32, i32, i32, i32) {
    %c0_i32 = arith.constant 0 : i32
    %c0_i32_0 = arith.constant 0 : i32
    %c0_i32_1 = arith.constant 0 : i32
    %c0_i32_2 = arith.constant 0 : i32
    return %arg0, %c0_i32, %c0_i32_0, %c0_i32_1 : i32, i32, i32, i32
  }
  func.func @transform_2(%arg0: i32, %arg1: i32) -> (i32, i32, i32) {
    %c0_i32 = arith.constant 0 : i32
    %c0_i32_0 = arith.constant 0 : i32
    %c0_i32_1 = arith.constant 0 : i32
    %c0_i32_2 = arith.constant 0 : i32
    return %c0_i32, %c0_i32_0, %c0_i32_1 : i32, i32, i32
  }
  func.func @transform_3(%arg0: i32, %arg1: i32) -> (i32, i32) {
    %c0_i32 = arith.constant 0 : i32
    %c0_i32_0 = arith.constant 0 : i32
    %c0_i32_1 = arith.constant 0 : i32
    return %c0_i32, %c0_i32_0 : i32, i32
  }
  func.func @transform_4(%arg0: i32, %arg1: i32) -> (i32, i32, i32, i32) {
    %c0_i32 = arith.constant 0 : i32
    %c0_i32_0 = arith.constant 0 : i32
    %c0_i32_1 = arith.constant 0 : i32
    return %arg0, %arg1, %c0_i32, %c0_i32_0 : i32, i32, i32, i32
  }
}

module attributes {stable_mosaic.version = 11 : i64} {
  func.func @_fused_mm_kernel(%arg0: i32, %arg1: memref<128x128xbf16, #tpu.memory_space<vmem>>, %arg2: memref<128x32xbf16, #tpu.memory_space<vmem>>, %arg3: memref<1x32xf32, #tpu.memory_space<vmem>>, %arg4: memref<128x32xbf16, #tpu.memory_space<vmem>>) attributes {dimension_semantics = [#tpu.dimension_semantics<parallel>], iteration_bounds = array<i64: 1>, scalar_prefetch = 0 : i64, scratch_operands = 0 : i64, tpu.core_type = #tpu.core_type<tc>, window_params = [{transform_indices = @transform_0, window_bounds = array<i64: 128, 128>}, {pipeline_mode = #tpu.pipeline_mode<synchronous>, transform_indices = @transform_1, window_bounds = array<i64: 128, 32>}, {pipeline_mode = #tpu.pipeline_mode<synchronous>, transform_indices = @transform_2, window_bounds = array<i64: 1, 32>}, {transform_indices = @transform_3, window_bounds = array<i64: 128, 32>}]} {
    %c0 = arith.constant 0 : index
    %c0_0 = arith.constant 0 : index
    %0 = vector.load %arg1[%c0, %c0_0] : memref<128x128xbf16, #tpu.memory_space<vmem>>, vector<128x128xbf16>
    %c0_1 = arith.constant 0 : index
    %c0_2 = arith.constant 0 : index
    %1 = vector.load %arg2[%c0_1, %c0_2] : memref<128x32xbf16, #tpu.memory_space<vmem>>, vector<128x32xbf16>
    %cst = arith.constant dense<0.000000e+00> : vector<128x32xf32>
    %2 = tpu.matmul %0, %1, %cst {dimension_numbers = #tpu.dot_dimension_numbers<[1], [0], [0], [1], [0, 0, 1, 1], [], []>} : vector<128x128xbf16>, vector<128x32xbf16>, vector<128x32xf32> -> vector<128x32xf32>
    %c0_3 = arith.constant 0 : index
    %c0_4 = arith.constant 0 : index
    %3 = vector.load %arg3[%c0_3, %c0_4] : memref<1x32xf32, #tpu.memory_space<vmem>>, vector<1x32xf32>
    %4 = vector.broadcast %3 : vector<1x32xf32> to vector<128x32xf32>
    %5 = arith.addf %2, %4 : vector<128x32xf32>
    %cst_5 = arith.constant 0.000000e+00 : f32
    %cst_6 = arith.constant 1.500000e+00 : f32
    %6 = vector.broadcast %cst_5 : f32 to vector<128x32xf32>
    %7 = arith.maximumf %6, %5 : vector<128x32xf32>
    %8 = vector.broadcast %cst_6 : f32 to vector<128x32xf32>
    %9 = arith.minimumf %8, %7 : vector<128x32xf32>
    %10 = arith.truncf %9 : vector<128x32xf32> to vector<128x32xbf16>
    %c0_7 = arith.constant 0 : index
    %c0_8 = arith.constant 0 : index
    %11 = vector.load %arg4[%c0_7, %c0_8] : memref<128x32xbf16, #tpu.memory_space<vmem>>, vector<128x32xbf16>
    tpu.vector_store %arg4[%c0_7, %c0_8], %10 {strides = array<i32>} : memref<128x32xbf16, #tpu.memory_space<vmem>>, vector<128x32xbf16>,
    return
  }
  func.func @transform_0(%arg0: i32) -> (i32, i32) {
    %c0_i32 = arith.constant 0 : i32
    %c0_i32_0 = arith.constant 0 : i32
    return %arg0, %c0_i32 : i32, i32
  }
  func.func @transform_1(%arg0: i32) -> (i32, i32) {
    %c0_i32 = arith.constant 0 : i32
    %c0_i32_0 = arith.constant 0 : i32
    %c0_i32_1 = arith.constant 0 : i32
    return %c0_i32, %c0_i32_0 : i32, i32
  }
  func.func @transform_2(%arg0: i32) -> (i32, i32) {
    %c0_i32 = arith.constant 0 : i32
    %c0_i32_0 = arith.constant 0 : i32
    %c0_i32_1 = arith.constant 0 : i32
    return %c0_i32, %c0_i32_0 : i32, i32
  }
  func.func @transform_3(%arg0: i32) -> (i32, i32) {
    %c0_i32 = arith.constant 0 : i32
    %c0_i32_0 = arith.constant 0 : i32
    return %arg0, %c0_i32 : i32, i32
  }
}

module attributes {stable_mosaic.version = 11 : i64} {
  func.func @_fused_mm_kernel(%arg0: i32, %arg1: memref<128x32xbf16, #tpu.memory_space<vmem>>, %arg2: memref<32x128xbf16, #tpu.memory_space<vmem>>, %arg3: memref<128x64xbf16, #tpu.memory_space<vmem>>, %arg4: memref<64x128xbf16, #tpu.memory_space<vmem>>, %arg5: memref<1x128xf32, #tpu.memory_space<vmem>>, %arg6: memref<128x128xbf16, #tpu.memory_space<vmem>>) attributes {dimension_semantics = [#tpu.dimension_semantics<parallel>], iteration_bounds = array<i64: 1>, scalar_prefetch = 0 : i64, scratch_operands = 0 : i64, tpu.core_type = #tpu.core_type<tc>, window_params = [{transform_indices = @transform_0, window_bounds = array<i64: 128, 32>}, {pipeline_mode = #tpu.pipeline_mode<synchronous>, transform_indices = @transform_1, window_bounds = array<i64: 32, 128>}, {transform_indices = @transform_2, window_bounds = array<i64: 128, 64>}, {pipeline_mode = #tpu.pipeline_mode<synchronous>, transform_indices = @transform_3, window_bounds = array<i64: 64, 128>}, {pipeline_mode = #tpu.pipeline_mode<synchronous>, transform_indices = @transform_4, window_bounds = array<i64: 1, 128>}, {transform_indices = @transform_5, window_bounds = array<i64: 128, 128>}]} {
    %c0 = arith.constant 0 : index
    %c0_0 = arith.constant 0 : index
    %0 = vector.load %arg1[%c0, %c0_0] : memref<128x32xbf16, #tpu.memory_space<vmem>>, vector<128x32xbf16>
    %c0_1 = arith.constant 0 : index
    %c0_2 = arith.constant 0 : index
    %1 = vector.load %arg2[%c0_1, %c0_2] : memref<32x128xbf16, #tpu.memory_space<vmem>>, vector<32x128xbf16>
    %cst = arith.constant dense<0.000000e+00> : vector<128x128xf32>
    %2 = tpu.matmul %0, %1, %cst {dimension_numbers = #tpu.dot_dimension_numbers<[1], [0], [0], [1], [0, 0, 1, 1], [], []>} : vector<128x32xbf16>, vector<32x128xbf16>, vector<128x128xf32> -> vector<128x128xf32>
    %c0_3 = arith.constant 0 : index
    %c0_4 = arith.constant 0 : index
    %3 = vector.load %arg3[%c0_3, %c0_4] : memref<128x64xbf16, #tpu.memory_space<vmem>>, vector<128x64xbf16>
    %c0_5 = arith.constant 0 : index
    %c0_6 = arith.constant 0 : index
    %4 = vector.load %arg4[%c0_5, %c0_6] : memref<64x128xbf16, #tpu.memory_space<vmem>>, vector<64x128xbf16>
    %cst_7 = arith.constant dense<0.000000e+00> : vector<128x128xf32>
    %5 = tpu.matmul %3, %4, %cst_7 {dimension_numbers = #tpu.dot_dimension_numbers<[1], [0], [0], [1], [0, 0, 1, 1], [], []>} : vector<128x64xbf16>, vector<64x128xbf16>, vector<128x128xf32> -> vector<128x128xf32>
    %6 = arith.addf %2, %5 : vector<128x128xf32>
    %c0_8 = arith.constant 0 : index
    %c0_9 = arith.constant 0 : index
    %7 = vector.load %arg5[%c0_8, %c0_9] : memref<1x128xf32, #tpu.memory_space<vmem>>, vector<1x128xf32>
    %8 = vector.broadcast %7 : vector<1x128xf32> to vector<128x128xf32>
    %9 = arith.addf %6, %8 : vector<128x128xf32>
    %cst_10 = arith.constant 0.000000e+00 : f32
    %cst_11 = arith.constant 1.500000e+00 : f32
    %10 = vector.broadcast %cst_10 : f32 to vector<128x128xf32>
    %11 = arith.maximumf %10, %9 : vector<128x128xf32>
    %12 = vector.broadcast %cst_11 : f32 to vector<128x128xf32>
    %13 = arith.minimumf %12, %11 : vector<128x128xf32>
    %14 = arith.truncf %13 : vector<128x128xf32> to vector<128x128xbf16>
    %c0_12 = arith.constant 0 : index
    %c0_13 = arith.constant 0 : index
    %15 = vector.load %arg6[%c0_12, %c0_13] : memref<128x128xbf16, #tpu.memory_space<vmem>>, vector<128x128xbf16>
    tpu.vector_store %arg6[%c0_12, %c0_13], %14 {strides = array<i32>} : memref<128x128xbf16, #tpu.memory_space<vmem>>, vector<128x128xbf16>,
    return
  }
  func.func @transform_0(%arg0: i32) -> (i32, i32) {
    %c0_i32 = arith.constant 0 : i32
    %c0_i32_0 = arith.constant 0 : i32
    return %arg0, %c0_i32 : i32, i32
  }
  func.func @transform_1(%arg0: i32) -> (i32, i32) {
    %c0_i32 = arith.constant 0 : i32
    %c0_i32_0 = arith.constant 0 : i32
    %c0_i32_1 = arith.constant 0 : i32
    return %c0_i32, %c0_i32_0 : i32, i32
  }
  func.func @transform_2(%arg0: i32) -> (i32, i32) {
    %c0_i32 = arith.constant 0 : i32
    %c0_i32_0 = arith.constant 0 : i32
    return %arg0, %c0_i32 : i32, i32
  }
  func.func @transform_3(%arg0: i32) -> (i32, i32) {
    %c0_i32 = arith.constant 0 : i32
    %c0_i32_0 = arith.constant 0 : i32
    %c0_i32_1 = arith.constant 0 : i32
    return %c0_i32, %c0_i32_0 : i32, i32
  }
  func.func @transform_4(%arg0: i32) -> (i32, i32) {
    %c0_i32 = arith.constant 0 : i32
    %c0_i32_0 = arith.constant 0 : i32
    %c0_i32_1 = arith.constant 0 : i32
    return %c0_i32, %c0_i32_0 : i32, i32
  }
  func.func @transform_5(%arg0: i32) -> (i32, i32) {
    %c0_i32 = arith.constant 0 : i32
    %c0_i32_0 = arith.constant 0 : i32
    return %arg0, %c0_i32 : i32, i32
  }
}

module attributes {stable_mosaic.version = 11 : i64} {
  func.func @_conv3x3_kernel(%arg0: i32, %arg1: i32, %arg2: memref<1x10x8x96xbf16, #tpu.memory_space<vmem>>, %arg3: memref<3x96x32xbf16, #tpu.memory_space<vmem>>, %arg4: memref<1x32xf32, #tpu.memory_space<vmem>>, %arg5: memref<1x4x8x32xbf16, #tpu.memory_space<vmem>>) attributes {dimension_semantics = [#tpu.dimension_semantics<parallel>, #tpu.dimension_semantics<parallel>], iteration_bounds = array<i64: 2, 2>, scalar_prefetch = 0 : i64, scratch_operands = 0 : i64, tpu.core_type = #tpu.core_type<tc>, window_params = [{transform_indices = @transform_0, window_bounds = array<i64: 1, 10, 8, 96>}, {pipeline_mode = #tpu.pipeline_mode<synchronous>, transform_indices = @transform_1, window_bounds = array<i64: 3, 96, 32>}, {pipeline_mode = #tpu.pipeline_mode<synchronous>, transform_indices = @transform_2, window_bounds = array<i64: 1, 32>}, {transform_indices = @transform_3, window_bounds = array<i64: 1, 4, 8, 32>}]} {
    %c4_i32 = arith.constant 4 : i32
    %0 = arith.muli %arg1, %c4_i32 : i32
    %c0_i32 = arith.constant 0 : i32
    %1 = arith.addi %0, %c0_i32 : i32
    %c0 = arith.constant 0 : index
    %2 = arith.index_cast %1 : i32 to index
    %c0_0 = arith.constant 0 : index
    %c0_1 = arith.constant 0 : index
    %3 = vector.load %arg2[%c0, %2, %c0_0, %c0_1] : memref<1x10x8x96xbf16, #tpu.memory_space<vmem>>, vector<1x4x8x96xbf16>
    %4 = vector.shape_cast %3 : vector<1x4x8x96xbf16> to vector<4x8x96xbf16>
    %5 = vector.shape_cast %4 : vector<4x8x96xbf16> to vector<32x96xbf16>
    %c0_2 = arith.constant 0 : index
    %c0_3 = arith.constant 0 : index
    %c0_4 = arith.constant 0 : index
    %6 = vector.load %arg3[%c0_2, %c0_3, %c0_4] : memref<3x96x32xbf16, #tpu.memory_space<vmem>>, vector<1x96x32xbf16>
    %7 = vector.shape_cast %6 : vector<1x96x32xbf16> to vector<96x32xbf16>
    %cst = arith.constant dense<0.000000e+00> : vector<32x32xf32>
    %8 = tpu.matmul %5, %7, %cst {dimension_numbers = #tpu.dot_dimension_numbers<[1], [0], [0], [1], [0, 0, 1, 1], [], []>} : vector<32x96xbf16>, vector<96x32xbf16>, vector<32x32xf32> -> vector<32x32xf32>
    %c1_i32 = arith.constant 1 : i32
    %9 = arith.addi %0, %c1_i32 : i32
    %c0_5 = arith.constant 0 : index
    %10 = arith.index_cast %9 : i32 to index
    %c0_6 = arith.constant 0 : index
    %c0_7 = arith.constant 0 : index
    %11 = vector.load %arg2[%c0_5, %10, %c0_6, %c0_7] : memref<1x10x8x96xbf16, #tpu.memory_space<vmem>>, vector<1x4x8x96xbf16>
    %12 = vector.shape_cast %11 : vector<1x4x8x96xbf16> to vector<4x8x96xbf16>
    %13 = vector.shape_cast %12 : vector<4x8x96xbf16> to vector<32x96xbf16>
    %c1 = arith.constant 1 : index
    %c0_8 = arith.constant 0 : index
    %c0_9 = arith.constant 0 : index
    %14 = vector.load %arg3[%c1, %c0_8, %c0_9] : memref<3x96x32xbf16, #tpu.memory_space<vmem>>, vector<1x96x32xbf16>
    %15 = vector.shape_cast %14 : vector<1x96x32xbf16> to vector<96x32xbf16>
    %cst_10 = arith.constant dense<0.000000e+00> : vector<32x32xf32>
    %16 = tpu.matmul %13, %15, %cst_10 {dimension_numbers = #tpu.dot_dimension_numbers<[1], [0], [0], [1], [0, 0, 1, 1], [], []>} : vector<32x96xbf16>, vector<96x32xbf16>, vector<32x32xf32> -> vector<32x32xf32>
    %17 = arith.addf %8, %16 : vector<32x32xf32>
    %c2_i32 = arith.constant 2 : i32
    %18 = arith.addi %0, %c2_i32 : i32
    %c0_11 = arith.constant 0 : index
    %19 = arith.index_cast %18 : i32 to index
    %c0_12 = arith.constant 0 : index
    %c0_13 = arith.constant 0 : index
    %20 = vector.load %arg2[%c0_11, %19, %c0_12, %c0_13] : memref<1x10x8x96xbf16, #tpu.memory_space<vmem>>, vector<1x4x8x96xbf16>
    %21 = vector.shape_cast %20 : vector<1x4x8x96xbf16> to vector<4x8x96xbf16>
    %22 = vector.shape_cast %21 : vector<4x8x96xbf16> to vector<32x96xbf16>
    %c2 = arith.constant 2 : index
    %c0_14 = arith.constant 0 : index
    %c0_15 = arith.constant 0 : index
    %23 = vector.load %arg3[%c2, %c0_14, %c0_15] : memref<3x96x32xbf16, #tpu.memory_space<vmem>>, vector<1x96x32xbf16>
    %24 = vector.shape_cast %23 : vector<1x96x32xbf16> to vector<96x32xbf16>
    %cst_16 = arith.constant dense<0.000000e+00> : vector<32x32xf32>
    %25 = tpu.matmul %22, %24, %cst_16 {dimension_numbers = #tpu.dot_dimension_numbers<[1], [0], [0], [1], [0, 0, 1, 1], [], []>} : vector<32x96xbf16>, vector<96x32xbf16>, vector<32x32xf32> -> vector<32x32xf32>
    %26 = arith.addf %17, %25 : vector<32x32xf32>
    %c0_17 = arith.constant 0 : index
    %c0_18 = arith.constant 0 : index
    %27 = vector.load %arg4[%c0_17, %c0_18] : memref<1x32xf32, #tpu.memory_space<vmem>>, vector<1x32xf32>
    %28 = vector.broadcast %27 : vector<1x32xf32> to vector<32x32xf32>
    %29 = arith.addf %26, %28 : vector<32x32xf32>
    %cst_19 = arith.constant 0.000000e+00 : f32
    %cst_20 = arith.constant 1.500000e+00 : f32
    %30 = vector.broadcast %cst_19 : f32 to vector<32x32xf32>
    %31 = arith.maximumf %30, %29 : vector<32x32xf32>
    %32 = vector.broadcast %cst_20 : f32 to vector<32x32xf32>
    %33 = arith.minimumf %32, %31 : vector<32x32xf32>
    %34 = vector.shape_cast %33 : vector<32x32xf32> to vector<1x4x8x32xf32>
    %35 = arith.truncf %34 : vector<1x4x8x32xf32> to vector<1x4x8x32xbf16>
    %c0_21 = arith.constant 0 : index
    %c0_22 = arith.constant 0 : index
    %c0_23 = arith.constant 0 : index
    %c0_24 = arith.constant 0 : index
    %36 = vector.load %arg5[%c0_21, %c0_22, %c0_23, %c0_24] : memref<1x4x8x32xbf16, #tpu.memory_space<vmem>>, vector<1x4x8x32xbf16>
    tpu.vector_store %arg5[%c0_21, %c0_22, %c0_23, %c0_24], %35 {strides = array<i32>} : memref<1x4x8x32xbf16, #tpu.memory_space<vmem>>, vector<1x4x8x32xbf16>,
    return
  }
  func.func @transform_0(%arg0: i32, %arg1: i32) -> (i32, i32, i32, i32) {
    %c0_i32 = arith.constant 0 : i32
    %c0_i32_0 = arith.constant 0 : i32
    %c0_i32_1 = arith.constant 0 : i32
    %c0_i32_2 = arith.constant 0 : i32
    return %arg0, %c0_i32, %c0_i32_0, %c0_i32_1 : i32, i32, i32, i32
  }
  func.func @transform_1(%arg0: i32, %arg1: i32) -> (i32, i32, i32) {
    %c0_i32 = arith.constant 0 : i32
    %c0_i32_0 = arith.constant 0 : i32
    %c0_i32_1 = arith.constant 0 : i32
    %c0_i32_2 = arith.constant 0 : i32
    return %c0_i32, %c0_i32_0, %c0_i32_1 : i32, i32, i32
  }
  func.func @transform_2(%arg0: i32, %arg1: i32) -> (i32, i32) {
    %c0_i32 = arith.constant 0 : i32
    %c0_i32_0 = arith.constant 0 : i32
    %c0_i32_1 = arith.constant 0 : i32
    return %c0_i32, %c0_i32_0 : i32, i32
  }
  func.func @transform_3(%arg0: i32, %arg1: i32) -> (i32, i32, i32, i32) {
    %c0_i32 = arith.constant 0 : i32
    %c0_i32_0 = arith.constant 0 : i32
    %c0_i32_1 = arith.constant 0 : i32
    return %arg0, %arg1, %c0_i32, %c0_i32_0 : i32, i32, i32, i32
  }
}

module attributes {stable_mosaic.version = 11 : i64} {
  func.func @_fused_mm_kernel(%arg0: i32, %arg1: memref<128x32xbf16, #tpu.memory_space<vmem>>, %arg2: memref<32x128xbf16, #tpu.memory_space<vmem>>, %arg3: memref<1x128xf32, #tpu.memory_space<vmem>>, %arg4: memref<128x128xbf16, #tpu.memory_space<vmem>>, %arg5: memref<128x128xbf16, #tpu.memory_space<vmem>>) attributes {dimension_semantics = [#tpu.dimension_semantics<parallel>], iteration_bounds = array<i64: 1>, scalar_prefetch = 0 : i64, scratch_operands = 0 : i64, tpu.core_type = #tpu.core_type<tc>, window_params = [{transform_indices = @transform_0, window_bounds = array<i64: 128, 32>}, {pipeline_mode = #tpu.pipeline_mode<synchronous>, transform_indices = @transform_1, window_bounds = array<i64: 32, 128>}, {pipeline_mode = #tpu.pipeline_mode<synchronous>, transform_indices = @transform_2, window_bounds = array<i64: 1, 128>}, {transform_indices = @transform_3, window_bounds = array<i64: 128, 128>}, {transform_indices = @transform_4, window_bounds = array<i64: 128, 128>}]} {
    %c0 = arith.constant 0 : index
    %c0_0 = arith.constant 0 : index
    %0 = vector.load %arg1[%c0, %c0_0] : memref<128x32xbf16, #tpu.memory_space<vmem>>, vector<128x32xbf16>
    %c0_1 = arith.constant 0 : index
    %c0_2 = arith.constant 0 : index
    %1 = vector.load %arg2[%c0_1, %c0_2] : memref<32x128xbf16, #tpu.memory_space<vmem>>, vector<32x128xbf16>
    %cst = arith.constant dense<0.000000e+00> : vector<128x128xf32>
    %2 = tpu.matmul %0, %1, %cst {dimension_numbers = #tpu.dot_dimension_numbers<[1], [0], [0], [1], [0, 0, 1, 1], [], []>} : vector<128x32xbf16>, vector<32x128xbf16>, vector<128x128xf32> -> vector<128x128xf32>
    %c0_3 = arith.constant 0 : index
    %c0_4 = arith.constant 0 : index
    %3 = vector.load %arg3[%c0_3, %c0_4] : memref<1x128xf32, #tpu.memory_space<vmem>>, vector<1x128xf32>
    %4 = vector.broadcast %3 : vector<1x128xf32> to vector<128x128xf32>
    %5 = arith.addf %2, %4 : vector<128x128xf32>
    %c0_5 = arith.constant 0 : index
    %c0_6 = arith.constant 0 : index
    %6 = vector.load %arg4[%c0_5, %c0_6] : memref<128x128xbf16, #tpu.memory_space<vmem>>, vector<128x128xbf16>
    %7 = arith.extf %6 : vector<128x128xbf16> to vector<128x128xf32>
    %8 = arith.addf %5, %7 : vector<128x128xf32>
    %cst_7 = arith.constant 0.000000e+00 : f32
    %cst_8 = arith.constant 1.500000e+00 : f32
    %9 = vector.broadcast %cst_7 : f32 to vector<128x128xf32>
    %10 = arith.maximumf %9, %8 : vector<128x128xf32>
    %11 = vector.broadcast %cst_8 : f32 to vector<128x128xf32>
    %12 = arith.minimumf %11, %10 : vector<128x128xf32>
    %13 = arith.truncf %12 : vector<128x128xf32> to vector<128x128xbf16>
    %c0_9 = arith.constant 0 : index
    %c0_10 = arith.constant 0 : index
    %14 = vector.load %arg5[%c0_9, %c0_10] : memref<128x128xbf16, #tpu.memory_space<vmem>>, vector<128x128xbf16>
    tpu.vector_store %arg5[%c0_9, %c0_10], %13 {strides = array<i32>} : memref<128x128xbf16, #tpu.memory_space<vmem>>, vector<128x128xbf16>,
    return
  }
  func.func @transform_0(%arg0: i32) -> (i32, i32) {
    %c0_i32 = arith.constant 0 : i32
    %c0_i32_0 = arith.constant 0 : i32
    return %arg0, %c0_i32 : i32, i32
  }
  func.func @transform_1(%arg0: i32) -> (i32, i32) {
    %c0_i32 = arith.constant 0 : i32
    %c0_i32_0 = arith.constant 0 : i32
    %c0_i32_1 = arith.constant 0 : i32
    return %c0_i32, %c0_i32_0 : i32, i32
  }
  func.func @transform_2(%arg0: i32) -> (i32, i32) {
    %c0_i32 = arith.constant 0 : i32
    %c0_i32_0 = arith.constant 0 : i32
    %c0_i32_1 = arith.constant 0 : i32
    return %c0_i32, %c0_i32_0 : i32, i32
  }
  func.func @transform_3(%arg0: i32) -> (i32, i32) {
    %c0_i32 = arith.constant 0 : i32
    %c0_i32_0 = arith.constant 0 : i32
    return %arg0, %c0_i32 : i32, i32
  }
  func.func @transform_4(%arg0: i32) -> (i32, i32) {
    %c0_i32 = arith.constant 0 : i32
    %c0_i32_0 = arith.constant 0 : i32
    return %arg0, %c0_i32 : i32, i32
  }
}

</mosaic_0001>

<bundles_post_ra>
// kernel: fwd.6
= control target key start
LH: loop header
LB: loop body
LE: loop exit
PB: predicated region body
PF: predicated region fallthrough
CT: control target
= control target key end

     0   :  { %s717_s12 = smov 0   ;;  %s816_s0 = inlined_call_operand.vmem [shape: bf16[512,64], index: 0, kind: input, shape index: {}]   ;;  %s817_s1 = inlined_call_operand.vmem [shape: bf16[64,32], index: 1, kind: input, shape index: {}]   ;;  %s818_s2 = inlined_call_operand.vmem [shape: f32[1,32], index: 2, kind: input, shape index: {}]   ;;  %s819_s3 = inlined_call_operand.vmem [shape: bf16[512,32], index: 3, kind: output, shape index: {}]  }
   0x1 LB: > { %s561_s13 = sadd.s32 4294967295, %s695_s12   ;;  %p565_p0 = scmp.ge.s32.totalorder %s695_s12, 1  ;;  %s695_s12 = sphi %s717_s12, %s13_s12  }
   0x2   : > { %p138_p1 = scmp.lt.s32.totalorder %s695_s12, 5 }
   0x4   : > { %p139_p2 = pnand %p565_p0, %p138_p1 }
   0x5   : > { %v677_v0 = vld [vmem:[%s817_s1] sm:$0xff] (!%p139_p2)   ;;  %s566_s16 = sshll.u32 (!%p139_p2), %s561_s13, 4  ;;  %v678_v1 = vld [vmem:[%s817_s1 + $0x8] sm:$0xff] (!%p139_p2)   ;;  %v679_v2 = vld [vmem:[%s817_s1 + $0x10] sm:$0xff] (!%p139_p2)   ;;  %vm270_vm0 = vcmask (!%p139_p2), 523264   ;;  %vm488_vm1 = vcmask (!%p139_p2), 257024  }
   0x6   : > { %142 = sbr.rel (%p139_p2) target bundleno = 255 (0xff), region = 32  ;;  %p163_p3 = scmp.lt.s32.totalorder (!%p139_p2), %s566_s16, 63  ;;  %637 = vmatprep.subr.bf16.mxu0 (!%p139_p2), %v677_v0  ;;  %661 = vmatprep.subr.bf16.mxu1 (!%p139_p2), %v677_v0  ;;  %v680_v3 = vld [vmem:[%s817_s1 + $0x18] sm:$0xff] (!%p139_p2)   ;;  %v756_v12 = vld [vmem:[%s818_s2] ss:$0 sm:$0xff] (!%p139_p2) }
   0x7   : > { %638 = vmatpush3.bf16.msra.mxu0 (!%p139_p2), %v677_v0  ;;  %665 = vmatpush3.bf16.msra.mxu1 (!%p139_p2), %v677_v0 }
   0x8   : > { %639 = vmatprep.subr.bf16.mxu0 (!%p139_p2), %v678_v1  ;;  %662 = vmatprep.subr.bf16.mxu1 (!%p139_p2), %v678_v1 }
   0xb   : > { %640 = vmatpush3.bf16.msra.mxu0 (!%p139_p2), %v678_v1  ;;  %666 = vmatpush3.bf16.msra.mxu1 (!%p139_p2), %v678_v1 }
   0xc   : > { %641 = vmatprep.subr.bf16.mxu0 (!%p139_p2), %v679_v2  ;;  %663 = vmatprep.subr.bf16.mxu1 (!%p139_p2), %v679_v2 }
   0xd   : > { %s821_s16 = smov (!%p163_p3, %s566_s16), 63 }
   0xe   : > { %s567_s21 = sshll.u32 %s821_s16, 2 }
   0xf   : > { %s166_s26 = scalar_lea.vmem %s816_s0, %s567_s21  ;;  %642 = vmatpush3.bf16.msra.mxu0 %v679_v2  ;;  %667 = vmatpush3.bf16.msra.mxu1 %v679_v2  ;;  %s771_s4 = scalar_lea.vmem %s819_s3, %s567_s21 }
  0x10   : > { %v681_v4 = vld [vmem:[%s166_s26] sm:$0xff]   ;;  %643 = vmatprep.subr.bf16.mxu0 %v680_v3  ;;  %664 = vmatprep.subr.bf16.mxu1 %v680_v3  ;;  %v683_v6 = vld [vmem:[%s166_s26 + $0x8] sm:$0xff]   ;;  %v685_v8 = vld [vmem:[%s166_s26 + $0x10] sm:$0xff]  }
  0x11   : > { %v682_v5 = vld [vmem:[%s166_s26 + $0x20] sm:$0xff]   ;;  %645 = vmatprep.mubr.msk.bf16.mxu0 %vm270_vm0, %v681_v4  ;;  %v684_v7 = vld [vmem:[%s166_s26 + $0x28] sm:$0xff]   ;;  %v686_v9 = vld [vmem:[%s166_s26 + $0x30] sm:$0xff]  }
  0x12   : > { %653 = vmatprep.mubr.msk.bf16.mxu1 %vm270_vm0, %v682_v5  ;;  %v687_v10 = vld [vmem:[%s166_s26 + $0x18] sm:$0xff]  }
  0x13   : > { %644 = vmatpush3.bf16.msra.mxu0 %v680_v3  ;;  %668 = vmatpush3.bf16.msra.mxu1 %v680_v3  ;;  %v688_v11 = vld [vmem:[%s166_s26 + $0x38] sm:$0xff]  }
  0x16   : > { %646 = vmatmul.mubr.msk.bf16.vlgmr.msra.gmra.mrb[0].mxu0 %vm270_vm0, %v683_v6  ;;  %654 = vmatmul.mubr.msk.bf16.vlgmr.msra.gmra.mrb[0].mxu1 %vm270_vm0, %v684_v7 }
  0x17   : > { %649 = vmatprep.mubr.msk.bf16.mxu0 %vm270_vm0, %v685_v8  ;;  %657 = vmatprep.mubr.msk.bf16.mxu1 %vm270_vm0, %v686_v9 }
  0x1e   : > { %650 = vmatmul.mubr.msk.bf16.gmra.mrb[4].mxu0 %vm270_vm0, %v687_v10  ;;  %658 = vmatmul.mubr.msk.bf16.gmra.mrb[4].mxu1 %vm270_vm0, %v688_v11 }
  0xe9   : > { %v647_v13 = vpop.f32.mrb[0].mxu0  ;;  %v655_v14 = vpop.f32.mrb[0].mxu1 }
  0xea   : > { %v338_v15 = vadd.f32 %v647_v13, %v756_v12  ;;  %v370_v16 = vadd.f32 %v655_v14, %v756_v12  ;;  %v329_v17 = vpop.f32.mrb[1].mxu0  ;;  %v361_v18 = vpop.f32.mrb[1].mxu1 }
  0xeb   : > { %v330_v19 = vadd.f32 %v756_v12, %v329_v17  ;;  %v362_v20 = vadd.f32 %v756_v12, %v361_v18  ;;  %v648_v21 = vpop.f32.mrb[2].mxu0  ;;  %v656_v22 = vpop.f32.mrb[2].mxu1 }
  0xec   : > { %v394_v23 = vmax.f32 %v338_v15, 0.0  ;;  %v402_v24 = vmax.f32 %v370_v16, 0.0  ;;  %v341_v25 = vadd.f32 %v648_v21, %v756_v12  ;;  %v373_v26 = vadd.f32 %v656_v22, %v756_v12  ;;  %v332_v27 = vpop.f32.mrb[3].mxu0  ;;  %v364_v28 = vpop.f32.mrb[3].mxu1 }
  0xed   : > { %v392_v29 = vmax.f32 %v330_v19, 0.0  ;;  %v400_v30 = vmax.f32 %v362_v20, 0.0  ;;  %v333_v31 = vadd.f32 %v756_v12, %v332_v27  ;;  %v365_v32 = vadd.f32 %v756_v12, %v364_v28 }
  0xee   : > { %v410_v33 = vmin.f32 %v394_v23, 1.5  ;;  %v418_v34 = vmin.f32 %v402_v24, 1.5  ;;  %v395_v35 = vmax.f32 %v341_v25, 0.0  ;;  %v403_v36 = vmax.f32 %v373_v26, 0.0 }
  0xef   : > { %v408_v37 = vmin.f32 %v392_v29, 1.5  ;;  %v416_v38 = vmin.f32 %v400_v30, 1.5  ;;  %v393_v39 = vmax.f32 %v333_v31, 0.0  ;;  %v401_v40 = vmax.f32 %v365_v32, 0.0 }
  0xf0   : > { %v611_v41 = vpack.c.bf16 %v410_v33, %v410_v33  ;;  %v619_v42 = vpack.c.bf16 %v418_v34, %v418_v34  ;;  %v411_v43 = vmin.f32 %v395_v35, 1.5  ;;  %v419_v44 = vmin.f32 %v403_v36, 1.5 }
  0xf1   : > { %v609_v45 = vpack.c.bf16 %v408_v37, %v408_v37  ;;  %v617_v46 = vpack.c.bf16 %v416_v38, %v416_v38  ;;  %v409_v47 = vmin.f32 %v393_v39, 1.5  ;;  %v417_v48 = vmin.f32 %v401_v40, 1.5  ;;  %v651_v49 = vpop.f32.mrb[4].mxu0  ;;  %v659_v50 = vpop.f32.mrb[4].mxu1 }
  0xf2   : > { %491 = vst.msk [vmem:[%s771_s4 + $0x8] sm:$0xf] %vm488_vm1, %v611_v41  ;;  %499 = vst.msk [vmem:[%s771_s4 + $0x28] sm:$0xf] %vm488_vm1, %v619_v42  ;;  %v612_v51 = vpack.c.bf16 %v411_v43, %v411_v43  ;;  %v620_v52 = vpack.c.bf16 %v419_v44, %v419_v44  ;;  %v354_v53 = vadd.f32 %v651_v49, %v756_v12  ;;  %v345_v55 = vpop.f32.mrb[5].mxu0  ;;  %v377_v56 = vpop.f32.mrb[5].mxu1 }
  0xf3   : > { %v386_v54 = vadd.f32 %v659_v50, %v756_v12  ;;  %489 = vst.msk [vmem:[%s771_s4] sm:$0xf] %vm488_vm1, %v609_v45  ;;  %497 = vst.msk [vmem:[%s771_s4 + $0x20] sm:$0xf] %vm488_vm1, %v617_v46  ;;  %v610_v57 = vpack.c.bf16 %v409_v47, %v409_v47  ;;  %v618_v58 = vpack.c.bf16 %v417_v48, %v417_v48  ;;  %v652_v61 = vpop.f32.mrb[6].mxu0  ;;  %v660_v62 = vpop.f32.mrb[6].mxu1 }
  0xf4   : > { %v346_v59 = vadd.f32 %v756_v12, %v345_v55  ;;  %v378_v60 = vadd.f32 %v756_v12, %v377_v56  ;;  %492 = vst.msk [vmem:[%s771_s4 + $0xc] sm:$0xf] %vm488_vm1, %v612_v51  ;;  %500 = vst.msk [vmem:[%s771_s4 + $0x2c] sm:$0xf] %vm488_vm1, %v620_v52  ;;  %v398_v63 = vmax.f32 %v354_v53, 0.0  ;;  %v357_v1 = vadd.f32 %v652_v61, %v756_v12  ;;  %v348_v3 = vpop.f32.mrb[7].mxu0 }
  0xf5   : > { %v406_v0 = vmax.f32 %v386_v54, 0.0  ;;  %v389_v2 = vadd.f32 %v660_v62, %v756_v12  ;;  %v380_v4 = vpop.f32.mrb[7].mxu1  ;;  %490 = vst.msk [vmem:[%s771_s4 + $0x4] sm:$0xf] %vm488_vm1, %v610_v57  ;;  %498 = vst.msk [vmem:[%s771_s4 + $0x24] sm:$0xf] %vm488_vm1, %v618_v58  ;;  %v349_v7 = vadd.f32 %v756_v12, %v348_v3 }
  0xf6   : > { %v396_v5 = vmax.f32 %v346_v59, 0.0  ;;  %v404_v6 = vmax.f32 %v378_v60, 0.0  ;;  %v381_v8 = vadd.f32 %v756_v12, %v380_v4  ;;  %v414_v9 = vmin.f32 %v398_v63, 1.5 }
  0xf7   : > { %v422_v10 = vmin.f32 %v406_v0, 1.5  ;;  %v399_v11 = vmax.f32 %v357_v1, 0.0  ;;  %v407_v13 = vmax.f32 %v389_v2, 0.0  ;;  %v397_v16 = vmax.f32 %v349_v7, 0.0 }
  0xf8   : > { %v412_v14 = vmin.f32 %v396_v5, 1.5  ;;  %v420_v15 = vmin.f32 %v404_v6, 1.5  ;;  %v405_v17 = vmax.f32 %v381_v8, 0.0  ;;  %v615_v18 = vpack.c.bf16 %v414_v9, %v414_v9 }
  0xf9   : > { %v623_v19 = vpack.c.bf16 %v422_v10, %v422_v10  ;;  %v415_v20 = vmin.f32 %v399_v11, 1.5  ;;  %v423_v21 = vmin.f32 %v407_v13, 1.5  ;;  %v413_v23 = vmin.f32 %v397_v16, 1.5 }
  0xfa   : > { %v613_v12 = vpack.c.bf16 %v412_v14, %v412_v14  ;;  %v621_v22 = vpack.c.bf16 %v420_v15, %v420_v15  ;;  %v421_v24 = vmin.f32 %v405_v17, 1.5  ;;  %495 = vst.msk [vmem:[%s771_s4 + $0x18] sm:$0xf] %vm488_vm1, %v615_v18 }
  0xfb   : > { %503 = vst.msk [vmem:[%s771_s4 + $0x38] sm:$0xf] %vm488_vm1, %v623_v19  ;;  %v616_v25 = vpack.c.bf16 %v415_v20, %v415_v20  ;;  %v624_v26 = vpack.c.bf16 %v423_v21, %v423_v21  ;;  %v614_v27 = vpack.c.bf16 %v413_v23, %v413_v23 }
  0xfc   : > { %493 = vst.msk [vmem:[%s771_s4 + $0x10] sm:$0xf] %vm488_vm1, %v613_v12  ;;  %501 = vst.msk [vmem:[%s771_s4 + $0x30] sm:$0xf] %vm488_vm1, %v621_v22  ;;  %v622_v28 = vpack.c.bf16 %v421_v24, %v421_v24 }
  0xfd   : > { %496 = vst.msk [vmem:[%s771_s4 + $0x1c] sm:$0xf] %vm488_vm1, %v616_v25  ;;  %504 = vst.msk [vmem:[%s771_s4 + $0x3c] sm:$0xf] %vm488_vm1, %v624_v26 }
  0xfe   : > { %494 = vst.msk [vmem:[%s771_s4 + $0x14] sm:$0xf] %vm488_vm1, %v614_v27  ;;  %502 = vst.msk [vmem:[%s771_s4 + $0x34] sm:$0xf] %vm488_vm1, %v622_v28 }
  0xff PF: > { %s13_s12 = sadd.s32 1, %s695_s12  }
 0x100   : > { %p10_p4 = scmp.ge.s32.totalorder %s13_s12, 6  }
 0x102   :  { %12 = sbr.rel (!%p10_p4) target bundleno = 1 (0x1), region = 62 }

// kernel: fwd.7
= control target key start
LH: loop header
LB: loop body
LE: loop exit
PB: predicated region body
PF: predicated region fallthrough
CT: control target
= control target key end

     0   :  { %s1029_s15 = smov 0   ;;  %s1031_s16 = smov 0   ;;  %s1160_s0 = inlined_call_operand.vmem [shape: bf16[2,9,8,96], index: 0, kind: input, shape index: {}]   ;;  %s1161_s1 = inlined_call_operand.vmem [shape: bf16[2,9,8,96], index: 1, kind: input, shape index: {}]   ;;  %s1162_s2 = inlined_call_operand.vmem [shape: bf16[3,96,32], index: 2, kind: input, shape index: {}]   ;;  %s1163_s3 = inlined_call_operand.vmem [shape: f32[1,32], index: 3, kind: input, shape index: {}]   ;;  %s1164_s4 = inlined_call_operand.vmem [shape: bf16[2,8,8,32], index: 4, kind: output, shape index: {}]  }
   0x1   :  { %s1033_s17 = smov 0   ;;  %s1035_s18 = smov 0  }
   0x2   :  { %s1037_s19 = smov 0  }
   0x3 LB: > { %s23_s20 = sadd.s32 1, %s994_s17  ;;  %s26_s21 = sadd.s32 1, %s998_s18  ;;  %s1002_s19 = sphi %s1037_s19, %s14_s19   ;;  %s998_s18 = sphi %s1035_s18, %s1168_s18   ;;  %s994_s17 = sphi %s1033_s17, %s1167_s17   ;;  %s990_s16 = sphi %s1031_s16, %s1166_s16   ;;  %s986_s15 = sphi %s1029_s15, %s1165_s15  }
   0x4   : > { %p24_p0 = scmp.ge.s32.totalorder %s23_s20, 2  ;;  %p744_p1 = scmp.ge.s32.totalorder %s1002_s19, 1 }
   0x5   : > { %p186_p2 = scmp.lt.s32.totalorder %s1002_s19, 5 }
   0x6   : > { %s1170_s20 = smov (%p24_p0, %s23_s20), 0  ;;  %s1172_s21 = smov (!%p24_p0, %s26_s21), %s998_s18 }
   0x7   : > { %p187_p3 = pnand %p744_p1, %p186_p2  ;;  %p28_p4 = scmp.ge.s32.totalorder %s1172_s21, 2 }
   0x8   : > { %v940_v0 = vld [vmem:[%s1162_s2] sm:$0xff] (!%p187_p3)   ;;  %p221_p5 = scmp.lt.s32.totalorder (!%p187_p3), %s990_s16, 1  ;;  %v941_v1 = vld [vmem:[%s1162_s2 + $0x8] sm:$0xff] (!%p187_p3)   ;;  %s816_s26 = sshll.u32 (!%p187_p3), %s986_s15, 4  ;;  %v942_v2 = vld [vmem:[%s1162_s2 + $0x10] sm:$0xff] (!%p187_p3)   ;;  %vm326_vm0 = vcmask (!%p187_p3), 785408  }
   0x9   : > { %s1174_s21 = smov (%p28_p4, %s1172_s21), 0  ;;  %190 = sbr.rel (%p187_p3) target bundleno = 284 (0x11c), region = 36 }
   0xa   : > { %859 = vmatprep.subr.bf16.mxu0 (!%p187_p3), %v940_v0  ;;  %v946_v3 = vld [vmem:[%s1162_s2 + $0x30] sm:$0xff] (!%p187_p3)   ;;  %v943_v4 = vld [vmem:[%s1162_s2 + $0x18] sm:$0xff] (!%p187_p3)   ;;  %v944_v7 = vld [vmem:[%s1162_s2 + $0x20] sm:$0xff] (!%p187_p3)   ;;  %s747_s7 = sshll.u32 (!%p187_p3), %s986_s15, 2  ;;  %vm631_vm1 = vcmask (!%p187_p3), 257024  }
   0xb   : > { %860 = vmatpush3.bf16.msra.mxu0 (!%p187_p3), %v940_v0  ;;  %843 = vmatprep.subr.bf16.mxu1 (!%p187_p3), %v946_v3  ;;  %v949_v6 = vld [vmem:[%s1162_s2 + $0x38] sm:$0xff] (!%p187_p3)   ;;  %v952_v8 = vld [vmem:[%s1162_s2 + $0x40] sm:$0xff] (!%p187_p3)   ;;  %v954_v9 = vld [vmem:[%s1162_s2 + $0x48] sm:$0xff] (!%p187_p3)   ;;  %p234_p6 = scmp.lt.s32.totalorder (!%p187_p3), %s747_s7, 7 }
   0xc   : > { %861 = vmatprep.subr.bf16.mxu0 (!%p187_p3), %v941_v1  ;;  %844 = vmatpush3.bf16.msra.mxu1 (!%p187_p3), %v946_v3  ;;  %v945_v10 = vld [vmem:[%s1162_s2 + $0x28] sm:$0xff] (!%p187_p3)   ;;  %v956_v11 = vld [vmem:[%s1162_s2 + $0x50] sm:$0xff] (!%p187_p3)   ;;  %v948_v13 = vld [vmem:[%s1162_s2 + $0x60] sm:$0xff] (!%p187_p3)  }
   0xd   : > { %845 = vmatprep.subr.bf16.mxu1 (!%p187_p3), %v949_v6  ;;  %v958_v15 = vld [vmem:[%s1162_s2 + $0x58] sm:$0xff] (!%p187_p3)   ;;  %v951_v17 = vld [vmem:[%s1162_s2 + $0x68] sm:$0xff] (!%p187_p3)   ;;  %v953_v18 = vld [vmem:[%s1162_s2 + $0x70] sm:$0xff] (!%p187_p3)  }
   0xe   : > { %v955_v20 = vld [vmem:[%s1162_s2 + $0x78] sm:$0xff] (!%p187_p3)   ;;  %v957_v21 = vld [vmem:[%s1162_s2 + $0x80] sm:$0xff] (!%p187_p3)   ;;  %v960_v22 = vld [vmem:[%s1162_s2 + $0x88] sm:$0xff] (!%p187_p3)  }
   0xf   : > { %862 = vmatpush3.bf16.msra.mxu0 (!%p187_p3), %v941_v1  ;;  %v813_v29 = vld [vmem:[%s1163_s3] ss:$0 sm:$0xff] (!%p187_p3) }
  0x10   : > { %s1176_s16 = smov (!%p221_p5, %s990_s16), 1  ;;  %863 = vmatprep.subr.bf16.mxu0 %v942_v2  ;;  %846 = vmatpush3.bf16.msra.mxu1 %v949_v6  ;;  %s1178_s7 = smov (!%p234_p6, %s747_s7), 7 }
  0x11   : > { %s899_s29 = smul.u32 36, %s1176_s16  ;;  %847 = vmatprep.subr.bf16.mxu1 %v952_v8 }
  0x13   : > { %s225_s8 = scalar_lea.vmem %s1160_s0, %s899_s29  ;;  %864 = vmatpush3.bf16.msra.mxu0 %v942_v2  ;;  %s230_s28 = scalar_lea.vmem %s1161_s1, %s899_s29 }
  0x14   : > { %s1083_s11 = scalar_lea.vmem %s225_s8, %s816_s26  ;;  %865 = vmatprep.subr.bf16.mxu0 %v943_v4  ;;  %s262_s8 = scalar_lea.vmem %s230_s28, %s816_s26  ;;  %848 = vmatpush3.bf16.msra.mxu1 %v952_v8 }
  0x15   : > { %v947_v5 = vld [vmem:[%s1083_s11] sm:$0xff]   ;;  %849 = vmatprep.subr.bf16.mxu1 %v954_v9  ;;  %v950_v14 = vld [vmem:[%s1083_s11 + $0x8] sm:$0xff]  }
  0x16   : > { %871 = vmatprep.mubr.msk.bf16.mxu0 %vm326_vm0, %v947_v5  ;;  %v959_v12 = vld [vmem:[%s262_s8] sm:$0xff]   ;;  %v961_v19 = vld [vmem:[%s262_s8 + $0x8] sm:$0xff]   ;;  %s748_s8 = sshll.u32 %s1176_s16, 3 }
  0x17   : > { %866 = vmatpush3.bf16.msra.mxu0 %v943_v4  ;;  %855 = vmatprep.mubr.msk.bf16.mxu1 %vm326_vm0, %v959_v12  ;;  %v962_v16 = vld [vmem:[%s1083_s11 + $0x4] sm:$0xff]   ;;  %v963_v23 = vld [vmem:[%s1083_s11 + $0xc] sm:$0xff]   ;;  %s237_s29 = sadd.s32 %s748_s8, %s1178_s7 }
  0x18   : > { %867 = vmatprep.subr.bf16.mxu0 %v944_v7  ;;  %850 = vmatpush3.bf16.msra.mxu1 %v954_v9  ;;  %s749_s11 = sshll.u32 %s237_s29, 2 }
  0x19   : > { %851 = vmatprep.subr.bf16.mxu1 %v956_v11  ;;  %s239_s12 = scalar_lea.vmem %s1164_s4, %s749_s11 }
  0x1b   : > { %868 = vmatpush3.bf16.msra.mxu0 %v944_v7 }
  0x1c   : > { %869 = vmatprep.subr.bf16.mxu0 %v945_v10  ;;  %852 = vmatpush3.bf16.msra.mxu1 %v956_v11 }
  0x1d   : > { %853 = vmatprep.subr.bf16.mxu1 %v958_v15 }
  0x1f   : > { %870 = vmatpush3.bf16.msra.mxu0 %v945_v10 }
  0x20   : > { %875 = vmatprep.subr.bf16.mxu0 %v948_v13  ;;  %854 = vmatpush3.bf16.msra.mxu1 %v958_v15 }
  0x22   : > { %872 = vmatmul.mubr.msk.bf16.vlgmr.msra.gmra.mrb[0].mxu0 %vm326_vm0, %v950_v14 }
  0x23   : > { %876 = vmatpush3.bf16.msra.mxu0 %v948_v13  ;;  %887 = vmatprep.mubr.msk.bf16.mxu0 %vm326_vm0, %v962_v16 }
  0x24   : > { %877 = vmatprep.subr.bf16.mxu0 %v951_v17  ;;  %856 = vmatmul.mubr.msk.bf16.vlgmr.msra.gmra.mrb[0].mxu1 %vm326_vm0, %v961_v19 }
  0x27   : > { %878 = vmatpush3.bf16.msra.mxu0 %v951_v17 }
  0x28   : > { %879 = vmatprep.subr.bf16.mxu0 %v953_v18 }
  0x2b   : > { %880 = vmatpush3.bf16.msra.mxu0 %v953_v18 }
  0x2c   : > { %881 = vmatprep.subr.bf16.mxu0 %v955_v20 }
  0x2f   : > { %882 = vmatpush3.bf16.msra.mxu0 %v955_v20 }
  0x30   : > { %883 = vmatprep.subr.bf16.mxu0 %v957_v21 }
  0x33   : > { %884 = vmatpush3.bf16.msra.mxu0 %v957_v21 }
  0x34   : > { %885 = vmatprep.subr.bf16.mxu0 %v960_v22 }
  0x37   : > { %886 = vmatpush3.bf16.msra.mxu0 %v960_v22 }
  0x3a   : > { %888 = vmatmul.mubr.msk.bf16.vlgmr.msra.gmra.mrb[0].mxu0 %vm326_vm0, %v963_v23 }
  0xf7   : > { %v857_v24 = vpop.f32.mrb[0].mxu1 }
  0xf8   : > { %v367_v25 = vpop.f32.mrb[1].mxu1 }
  0xf9   : > { %v858_v26 = vpop.f32.mrb[2].mxu1 }
  0xfa   : > { %v370_v27 = vpop.f32.mrb[3].mxu1 }
 0x10d   : > { %v889_v28 = vpop.f32.mrb[0].mxu0 }
 0x10e   : > { %v891_v30 = vadd.f32 %v889_v28, %v857_v24  ;;  %v589_v31 = vpop.f32.mrb[1].mxu0 }
 0x10f   : > { %v892_v32 = vadd.f32 %v589_v31, %v367_v25  ;;  %v890_v33 = vpop.f32.mrb[2].mxu0 }
 0x110   : > { %v617_v34 = vadd.f32 %v891_v30, %v813_v29  ;;  %v893_v35 = vadd.f32 %v890_v33, %v858_v26  ;;  %v592_v36 = vpop.f32.mrb[3].mxu0 }
 0x111   : > { %v615_v37 = vadd.f32 %v892_v32, %v813_v29  ;;  %v894_v38 = vadd.f32 %v592_v36, %v370_v27 }
 0x112   : > { %v621_v39 = vmax.f32 %v617_v34, 0.0  ;;  %v618_v40 = vadd.f32 %v893_v35, %v813_v29 }
 0x113   : > { %v619_v41 = vmax.f32 %v615_v37, 0.0  ;;  %v616_v42 = vadd.f32 %v894_v38, %v813_v29 }
 0x114   : > { %v625_v43 = vmin.f32 %v621_v39, 1.5  ;;  %v622_v44 = vmax.f32 %v618_v40, 0.0 }
 0x115   : > { %v623_v45 = vmin.f32 %v619_v41, 1.5  ;;  %v620_v46 = vmax.f32 %v616_v42, 0.0 }
 0x116   : > { %v629_v47 = vpack.c.bf16 %v625_v43, %v625_v43  ;;  %v626_v48 = vmin.f32 %v622_v44, 1.5 }
 0x117   : > { %v627_v49 = vpack.c.bf16 %v623_v45, %v623_v45  ;;  %v624_v50 = vmin.f32 %v620_v46, 1.5 }
 0x118   : > { %634 = vst.msk [vmem:[%s239_s12 + $0x8] sm:$0xf] %vm631_vm1, %v629_v47  ;;  %v630_v51 = vpack.c.bf16 %v626_v48, %v626_v48 }
 0x119   : > { %632 = vst.msk [vmem:[%s239_s12] sm:$0xf] %vm631_vm1, %v627_v49  ;;  %v628_v52 = vpack.c.bf16 %v624_v50, %v624_v50 }
 0x11a   : > { %635 = vst.msk [vmem:[%s239_s12 + $0xc] sm:$0xf] %vm631_vm1, %v630_v51 }
 0x11b   : > { %633 = vst.msk [vmem:[%s239_s12 + $0x4] sm:$0xf] %vm631_vm1, %v628_v52 }
 0x11c PF: > { %s14_s19 = sadd.s32 1, %s1002_s19   ;;  %s1165_s15 = smov %s994_s17 }
 0x11d   : > { %p11_p7 = scmp.ge.s32.totalorder %s14_s19, 6   ;;  %s1166_s16 = smov %s998_s18 }
 0x11e   : > { %s1167_s17 = smov %s1170_s20  ;;  %s1168_s18 = smov %s1174_s21 }
 0x11f   :  { %13 = sbr.rel (!%p11_p7) target bundleno = 3 (0x3), region = 74 }

// kernel: fwd.9
= control target key start
LH: loop header
LB: loop body
LE: loop exit
PB: predicated region body
PF: predicated region fallthrough
CT: control target
= control target key end

     0   :  { %vm343_vm0 = vcmask 257024   ;;  %s646_s1 = inlined_call_operand.vmem [shape: bf16[128,32], index: 1, kind: input, shape index: {}]   ;;  %s647_s0 = inlined_call_operand.vmem [shape: bf16[128,128], index: 0, kind: input, shape index: {}]   ;;  %s648_s2 = inlined_call_operand.vmem [shape: f32[1,32], index: 2, kind: input, shape index: {}]   ;;  %s649_s3 = inlined_call_operand.vmem [shape: bf16[128,32], index: 3, kind: output, shape index: {}]  }
   0x1   :  { %v477_v0 = vld [vmem:[%s646_s1] sm:$0xff]   ;;  %v478_v1 = vld [vmem:[%s646_s1 + $0x8] sm:$0xff]   ;;  %v479_v2 = vld [vmem:[%s646_s1 + $0x10] sm:$0xff]  }
   0x2   :  { %429 = vmatprep.subr.bf16.mxu0 %v477_v0  ;;  %461 = vmatprep.subr.bf16.mxu1 %v477_v0  ;;  %v480_v3 = vld [vmem:[%s646_s1 + $0x18] sm:$0xff]   ;;  %v485_v4 = vld [vmem:[%s647_s0] sm:$0xff]   ;;  %v482_v7 = vld [vmem:[%s646_s1 + $0x28] sm:$0xff]  }
   0x3   :  { %430 = vmatpush3.bf16.msra.mxu0 %v477_v0  ;;  %469 = vmatpush3.bf16.msra.mxu1 %v477_v0  ;;  %v486_v5 = vld [vmem:[%s647_s0 + $0x20] sm:$0xff]   ;;  %v483_v8 = vld [vmem:[%s646_s1 + $0x30] sm:$0xff]   ;;  %v484_v9 = vld [vmem:[%s646_s1 + $0x38] sm:$0xff]  }
   0x4   :  { %431 = vmatprep.subr.bf16.mxu0 %v478_v1  ;;  %462 = vmatprep.subr.bf16.mxu1 %v478_v1  ;;  %v481_v6 = vld [vmem:[%s646_s1 + $0x20] sm:$0xff]   ;;  %v487_v10 = vld [vmem:[%s647_s0 + $0x8] sm:$0xff]   ;;  %v489_v12 = vld [vmem:[%s647_s0 + $0x10] sm:$0xff]  }
   0x5   :  { %445 = vmatprep.mubr.bf16.mxu0 %v485_v4  ;;  %453 = vmatprep.mubr.bf16.mxu1 %v486_v5  ;;  %v488_v11 = vld [vmem:[%s647_s0 + $0x28] sm:$0xff]   ;;  %v490_v13 = vld [vmem:[%s647_s0 + $0x30] sm:$0xff]   ;;  %v491_v14 = vld [vmem:[%s647_s0 + $0x18] sm:$0xff]  }
   0x6   :  { %v492_v15 = vld [vmem:[%s647_s0 + $0x38] sm:$0xff]   ;;  %v564_v16 = vld [vmem:[%s648_s2] ss:$0 sm:$0xff] }
   0x7   :  { %432 = vmatpush3.bf16.msra.mxu0 %v478_v1  ;;  %470 = vmatpush3.bf16.msra.mxu1 %v478_v1 }
   0x8   :  { %433 = vmatprep.subr.bf16.mxu0 %v479_v2  ;;  %463 = vmatprep.subr.bf16.mxu1 %v479_v2 }
   0xb   :  { %434 = vmatpush3.bf16.msra.mxu0 %v479_v2  ;;  %471 = vmatpush3.bf16.msra.mxu1 %v479_v2 }
   0xc   :  { %435 = vmatprep.subr.bf16.mxu0 %v480_v3  ;;  %464 = vmatprep.subr.bf16.mxu1 %v480_v3 }
   0xf   :  { %436 = vmatpush3.bf16.msra.mxu0 %v480_v3  ;;  %472 = vmatpush3.bf16.msra.mxu1 %v480_v3 }
  0x10   :  { %437 = vmatprep.subr.bf16.mxu0 %v481_v6  ;;  %465 = vmatprep.subr.bf16.mxu1 %v481_v6 }
  0x13   :  { %438 = vmatpush3.bf16.msra.mxu0 %v481_v6  ;;  %473 = vmatpush3.bf16.msra.mxu1 %v481_v6 }
  0x14   :  { %439 = vmatprep.subr.bf16.mxu0 %v482_v7  ;;  %466 = vmatprep.subr.bf16.mxu1 %v482_v7 }
  0x17   :  { %440 = vmatpush3.bf16.msra.mxu0 %v482_v7  ;;  %474 = vmatpush3.bf16.msra.mxu1 %v482_v7 }
  0x18   :  { %441 = vmatprep.subr.bf16.mxu0 %v483_v8  ;;  %467 = vmatprep.subr.bf16.mxu1 %v483_v8 }
  0x1b   :  { %442 = vmatpush3.bf16.msra.mxu0 %v483_v8  ;;  %475 = vmatpush3.bf16.msra.mxu1 %v483_v8 }
  0x1c   :  { %443 = vmatprep.subr.bf16.mxu0 %v484_v9  ;;  %468 = vmatprep.subr.bf16.mxu1 %v484_v9 }
  0x1f   :  { %444 = vmatpush3.bf16.msra.mxu0 %v484_v9  ;;  %476 = vmatpush3.bf16.msra.mxu1 %v484_v9 }
  0x22   :  { %446 = vmatmul.mubr.bf16.vlgmr.msra.gmra.mrb[0].mxu0 %v487_v10  ;;  %454 = vmatmul.mubr.bf16.vlgmr.msra.gmra.mrb[0].mxu1 %v488_v11 }
  0x23   :  { %449 = vmatprep.mubr.bf16.mxu0 %v489_v12  ;;  %457 = vmatprep.mubr.bf16.mxu1 %v490_v13 }
  0x2a   :  { %450 = vmatmul.mubr.bf16.gmra.mrb[4].mxu0 %v491_v14  ;;  %458 = vmatmul.mubr.bf16.gmra.mrb[4].mxu1 %v492_v15 }
  0xf5   :  { %v447_v17 = vpop.f32.mrb[0].mxu0  ;;  %v455_v18 = vpop.f32.mrb[0].mxu1 }
  0xf6   :  { %v193_v19 = vadd.f32 %v447_v17, %v564_v16  ;;  %v225_v20 = vadd.f32 %v455_v18, %v564_v16  ;;  %v184_v21 = vpop.f32.mrb[1].mxu0  ;;  %v216_v22 = vpop.f32.mrb[1].mxu1 }
  0xf7   :  { %v185_v23 = vadd.f32 %v564_v16, %v184_v21  ;;  %v217_v24 = vadd.f32 %v564_v16, %v216_v22  ;;  %v448_v25 = vpop.f32.mrb[2].mxu0  ;;  %v456_v26 = vpop.f32.mrb[2].mxu1 }
  0xf8   :  { %v249_v27 = vmax.f32 %v193_v19, 0.0  ;;  %v257_v28 = vmax.f32 %v225_v20, 0.0  ;;  %v196_v29 = vadd.f32 %v448_v25, %v564_v16  ;;  %v228_v30 = vadd.f32 %v456_v26, %v564_v16  ;;  %v187_v31 = vpop.f32.mrb[3].mxu0  ;;  %v219_v32 = vpop.f32.mrb[3].mxu1 }
  0xf9   :  { %v247_v33 = vmax.f32 %v185_v23, 0.0  ;;  %v255_v34 = vmax.f32 %v217_v24, 0.0  ;;  %v188_v35 = vadd.f32 %v564_v16, %v187_v31  ;;  %v220_v36 = vadd.f32 %v564_v16, %v219_v32 }
  0xfa   :  { %v265_v37 = vmin.f32 %v249_v27, 1.5  ;;  %v273_v38 = vmin.f32 %v257_v28, 1.5  ;;  %v250_v39 = vmax.f32 %v196_v29, 0.0  ;;  %v258_v40 = vmax.f32 %v228_v30, 0.0 }
  0xfb   :  { %v263_v41 = vmin.f32 %v247_v33, 1.5  ;;  %v271_v42 = vmin.f32 %v255_v34, 1.5  ;;  %v248_v43 = vmax.f32 %v188_v35, 0.0  ;;  %v256_v44 = vmax.f32 %v220_v36, 0.0 }
  0xfc   :  { %v399_v45 = vpack.c.bf16 %v265_v37, %v265_v37  ;;  %v407_v46 = vpack.c.bf16 %v273_v38, %v273_v38  ;;  %v266_v47 = vmin.f32 %v250_v39, 1.5  ;;  %v274_v48 = vmin.f32 %v258_v40, 1.5 }
  0xfd   :  { %v397_v49 = vpack.c.bf16 %v263_v41, %v263_v41  ;;  %v405_v50 = vpack.c.bf16 %v271_v42, %v271_v42  ;;  %v264_v51 = vmin.f32 %v248_v43, 1.5  ;;  %v272_v52 = vmin.f32 %v256_v44, 1.5  ;;  %v451_v53 = vpop.f32.mrb[4].mxu0  ;;  %v459_v54 = vpop.f32.mrb[4].mxu1 }
  0xfe   :  { %346 = vst.msk [vmem:[%s649_s3 + $0x8] sm:$0xf] %vm343_vm0, %v399_v45  ;;  %354 = vst.msk [vmem:[%s649_s3 + $0x28] sm:$0xf] %vm343_vm0, %v407_v46  ;;  %v400_v55 = vpack.c.bf16 %v266_v47, %v266_v47  ;;  %v408_v56 = vpack.c.bf16 %v274_v48, %v274_v48  ;;  %v209_v57 = vadd.f32 %v451_v53, %v564_v16  ;;  %v200_v59 = vpop.f32.mrb[5].mxu0  ;;  %v232_v60 = vpop.f32.mrb[5].mxu1 }
  0xff   :  { %v241_v58 = vadd.f32 %v459_v54, %v564_v16  ;;  %344 = vst.msk [vmem:[%s649_s3] sm:$0xf] %vm343_vm0, %v397_v49  ;;  %352 = vst.msk [vmem:[%s649_s3 + $0x20] sm:$0xf] %vm343_vm0, %v405_v50  ;;  %v398_v61 = vpack.c.bf16 %v264_v51, %v264_v51  ;;  %v406_v62 = vpack.c.bf16 %v272_v52, %v272_v52  ;;  %v452_v1 = vpop.f32.mrb[6].mxu0  ;;  %v460_v2 = vpop.f32.mrb[6].mxu1 }
 0x100   :  { %v201_v63 = vadd.f32 %v564_v16, %v200_v59  ;;  %v233_v0 = vadd.f32 %v564_v16, %v232_v60  ;;  %347 = vst.msk [vmem:[%s649_s3 + $0xc] sm:$0xf] %vm343_vm0, %v400_v55  ;;  %355 = vst.msk [vmem:[%s649_s3 + $0x2c] sm:$0xf] %vm343_vm0, %v408_v56  ;;  %v253_v3 = vmax.f32 %v209_v57, 0.0  ;;  %v212_v5 = vadd.f32 %v452_v1, %v564_v16  ;;  %v203_v7 = vpop.f32.mrb[7].mxu0 }
 0x101   :  { %v261_v4 = vmax.f32 %v241_v58, 0.0  ;;  %v244_v6 = vadd.f32 %v460_v2, %v564_v16  ;;  %v235_v8 = vpop.f32.mrb[7].mxu1  ;;  %345 = vst.msk [vmem:[%s649_s3 + $0x4] sm:$0xf] %vm343_vm0, %v398_v61  ;;  %353 = vst.msk [vmem:[%s649_s3 + $0x24] sm:$0xf] %vm343_vm0, %v406_v62  ;;  %v204_v11 = vadd.f32 %v564_v16, %v203_v7 }
 0x102   :  { %v251_v9 = vmax.f32 %v201_v63, 0.0  ;;  %v259_v10 = vmax.f32 %v233_v0, 0.0  ;;  %v236_v12 = vadd.f32 %v564_v16, %v235_v8  ;;  %v269_v13 = vmin.f32 %v253_v3, 1.5 }
 0x103   :  { %v277_v14 = vmin.f32 %v261_v4, 1.5  ;;  %v254_v15 = vmax.f32 %v212_v5, 0.0  ;;  %v262_v17 = vmax.f32 %v244_v6, 0.0  ;;  %v252_v20 = vmax.f32 %v204_v11, 0.0 }
 0x104   :  { %v267_v18 = vmin.f32 %v251_v9, 1.5  ;;  %v275_v19 = vmin.f32 %v259_v10, 1.5  ;;  %v260_v21 = vmax.f32 %v236_v12, 0.0  ;;  %v403_v22 = vpack.c.bf16 %v269_v13, %v269_v13 }
 0x105   :  { %v411_v23 = vpack.c.bf16 %v277_v14, %v277_v14  ;;  %v270_v24 = vmin.f32 %v254_v15, 1.5  ;;  %v278_v25 = vmin.f32 %v262_v17, 1.5  ;;  %v268_v28 = vmin.f32 %v252_v20, 1.5 }
 0x106   :  { %v401_v26 = vpack.c.bf16 %v267_v18, %v267_v18  ;;  %v409_v27 = vpack.c.bf16 %v275_v19, %v275_v19  ;;  %v276_v29 = vmin.f32 %v260_v21, 1.5  ;;  %350 = vst.msk [vmem:[%s649_s3 + $0x18] sm:$0xf] %vm343_vm0, %v403_v22 }
 0x107   :  { %358 = vst.msk [vmem:[%s649_s3 + $0x38] sm:$0xf] %vm343_vm0, %v411_v23  ;;  %v404_v16 = vpack.c.bf16 %v270_v24, %v270_v24  ;;  %v412_v30 = vpack.c.bf16 %v278_v25, %v278_v25  ;;  %v402_v31 = vpack.c.bf16 %v268_v28, %v268_v28 }
 0x108   :  { %348 = vst.msk [vmem:[%s649_s3 + $0x10] sm:$0xf] %vm343_vm0, %v401_v26  ;;  %356 = vst.msk [vmem:[%s649_s3 + $0x30] sm:$0xf] %vm343_vm0, %v409_v27  ;;  %v410_v32 = vpack.c.bf16 %v276_v29, %v276_v29 }
 0x109   :  { %351 = vst.msk [vmem:[%s649_s3 + $0x1c] sm:$0xf] %vm343_vm0, %v404_v16  ;;  %359 = vst.msk [vmem:[%s649_s3 + $0x3c] sm:$0xf] %vm343_vm0, %v412_v30 }
 0x10a   :  { %349 = vst.msk [vmem:[%s649_s3 + $0x14] sm:$0xf] %vm343_vm0, %v402_v31  ;;  %357 = vst.msk [vmem:[%s649_s3 + $0x34] sm:$0xf] %vm343_vm0, %v410_v32 }

// kernel: fwd.8
= control target key start
LH: loop header
LB: loop body
LE: loop exit
PB: predicated region body
PF: predicated region fallthrough
CT: control target
= control target key end

     0   :  { %vm303_vm0 = vcmask 261120   ;;  %vm129_vm1 = vcmask 523264   ;;  %s943_s3 = inlined_call_operand.vmem [shape: bf16[64,128], index: 3, kind: input, shape index: {}]   ;;  %s944_s1 = inlined_call_operand.vmem [shape: bf16[32,128], index: 1, kind: input, shape index: {}]   ;;  %s945_s0 = inlined_call_operand.vmem [shape: bf16[128,32], index: 0, kind: input, shape index: {}]   ;;  %s946_s2 = inlined_call_operand.vmem [shape: bf16[128,64], index: 2, kind: input, shape index: {}]   ;;  %s947_s4 = inlined_call_operand.vmem [shape: f32[1,128], index: 4, kind: input, shape index: {}]   ;;  %s948_s5 = inlined_call_operand.vmem [shape: bf16[128,128], index: 5, kind: output, shape index: {}]  }
   0x1   :  { %v764_v0 = vld [vmem:[%s943_s3] sm:$0xff]   ;;  %v765_v1 = vld [vmem:[%s943_s3 + $0x8] sm:$0xff]   ;;  %v767_v3 = vld [vmem:[%s943_s3 + $0x10] sm:$0xff]  }
   0x2   :  { %704 = vmatprep.subr.bf16.mxu1 %v764_v0  ;;  %v766_v2 = vld [vmem:[%s944_s1] sm:$0xff]   ;;  %v768_v4 = vld [vmem:[%s944_s1 + $0x8] sm:$0xff]   ;;  %v769_v5 = vld [vmem:[%s943_s3 + $0x18] sm:$0xff]  }
   0x3   :  { %705 = vmatpush3.bf16.msra.mxu1 %v764_v0  ;;  %728 = vmatprep.subr.bf16.mxu0 %v766_v2  ;;  %v770_v6 = vld [vmem:[%s945_s0] sm:$0xff]   ;;  %v771_v7 = vld [vmem:[%s945_s0 + $0x8] sm:$0xff]   ;;  %v774_v9 = vld [vmem:[%s945_s0 + $0x10] sm:$0xff]  }
   0x4   :  { %706 = vmatprep.subr.bf16.mxu1 %v765_v1  ;;  %729 = vmatpush3.bf16.msra.mxu0 %v766_v2  ;;  %v772_v8 = vld [vmem:[%s946_s2] sm:$0xff]   ;;  %v773_v10 = vld [vmem:[%s946_s2 + $0x8] sm:$0xff]   ;;  %v776_v11 = vld [vmem:[%s946_s2 + $0x10] sm:$0xff]  }
   0x5   :  { %730 = vmatprep.subr.bf16.mxu0 %v768_v4  ;;  %732 = vmatprep.mubr.msk.bf16.mxu0 %vm303_vm0, %v770_v6  ;;  %v775_v12 = vld [vmem:[%s945_s0 + $0x18] sm:$0xff]   ;;  %v778_v13 = vld [vmem:[%s945_s0 + $0x20] sm:$0xff]   ;;  %v779_v16 = vld [vmem:[%s945_s0 + $0x28] sm:$0xff]  }
   0x6   :  { %712 = vmatprep.mubr.msk.bf16.mxu1 %vm129_vm1, %v772_v8  ;;  %v777_v14 = vld [vmem:[%s946_s2 + $0x18] sm:$0xff]   ;;  %v780_v15 = vld [vmem:[%s946_s2 + $0x20] sm:$0xff]   ;;  %v782_v17 = vld [vmem:[%s945_s0 + $0x30] sm:$0xff]  }
   0x7   :  { %707 = vmatpush3.bf16.msra.mxu1 %v765_v1  ;;  %v781_v18 = vld [vmem:[%s946_s2 + $0x28] sm:$0xff]   ;;  %v784_v19 = vld [vmem:[%s946_s2 + $0x30] sm:$0xff]   ;;  %v783_v20 = vld [vmem:[%s945_s0 + $0x38] sm:$0xff]  }
   0x8   :  { %708 = vmatprep.subr.bf16.mxu1 %v767_v3  ;;  %731 = vmatpush3.bf16.msra.mxu0 %v768_v4  ;;  %v785_v21 = vld [vmem:[%s946_s2 + $0x38] sm:$0xff]   ;;  %v901_v27 = vld [vmem:[%s947_s4] ss:$0 sm:$0xff] }
   0xb   :  { %709 = vmatpush3.bf16.msra.mxu1 %v767_v3  ;;  %733 = vmatmul.mubr.msk.bf16.vlgmr.msra.gmra.mrb[0].mxu0 %vm303_vm0, %v771_v7 }
   0xc   :  { %710 = vmatprep.subr.bf16.mxu1 %v769_v5  ;;  %736 = vmatprep.mubr.msk.bf16.mxu0 %vm303_vm0, %v774_v9 }
   0xf   :  { %711 = vmatpush3.bf16.msra.mxu1 %v769_v5 }
  0x12   :  { %713 = vmatmul.mubr.msk.bf16.vlgmr.msra.gmra.mrb[0].mxu1 %vm129_vm1, %v773_v10 }
  0x13   :  { %716 = vmatprep.mubr.msk.bf16.mxu1 %vm129_vm1, %v776_v11  ;;  %737 = vmatmul.mubr.msk.bf16.gmra.mrb[4].mxu0 %vm303_vm0, %v775_v12 }
  0x14   :  { %740 = vmatprep.mubr.msk.bf16.mxu0 %vm303_vm0, %v778_v13 }
  0x1a   :  { %717 = vmatmul.mubr.msk.bf16.gmra.mrb[4].mxu1 %vm129_vm1, %v777_v14 }
  0x1b   :  { %720 = vmatprep.mubr.msk.bf16.mxu1 %vm129_vm1, %v780_v15  ;;  %741 = vmatmul.mubr.msk.bf16.gmra.mrb[8].mxu0 %vm303_vm0, %v779_v16 }
  0x1c   :  { %744 = vmatprep.mubr.msk.bf16.mxu0 %vm303_vm0, %v782_v17 }
  0x22   :  { %721 = vmatmul.mubr.msk.bf16.gmra.mrb[8].mxu1 %vm129_vm1, %v781_v18 }
  0x23   :  { %724 = vmatprep.mubr.msk.bf16.mxu1 %vm129_vm1, %v784_v19  ;;  %745 = vmatmul.mubr.msk.bf16.gmra.mrb[12].mxu0 %vm303_vm0, %v783_v20 }
  0x2a   :  { %725 = vmatmul.mubr.msk.bf16.gmra.mrb[12].mxu1 %vm129_vm1, %v785_v21 }
  0xde   :  { %v734_v22 = vpop.f32.mrb[0].mxu0 }
  0xdf   :  { %v362_v23 = vpop.f32.mrb[1].mxu0 }
  0xe0   :  { %v735_v24 = vpop.f32.mrb[2].mxu0 }
  0xe1   :  { %v365_v25 = vpop.f32.mrb[3].mxu0 }
  0xe5   :  { %v714_v26 = vpop.f32.mrb[0].mxu1 }
  0xe6   :  { %v371_v28 = vadd.f32 %v734_v22, %v714_v26  ;;  %v188_v29 = vpop.f32.mrb[1].mxu1  ;;  %v738_v32 = vpop.f32.mrb[4].mxu0 }
  0xe7   :  { %v363_v30 = vadd.f32 %v362_v23, %v188_v29  ;;  %v715_v31 = vpop.f32.mrb[2].mxu1  ;;  %v378_v36 = vpop.f32.mrb[5].mxu0 }
  0xe8   :  { %v434_v33 = vadd.f32 %v901_v27, %v371_v28  ;;  %v374_v34 = vadd.f32 %v735_v24, %v715_v31  ;;  %v191_v35 = vpop.f32.mrb[3].mxu1  ;;  %v739_v39 = vpop.f32.mrb[6].mxu0 }
  0xe9   :  { %v432_v37 = vadd.f32 %v901_v27, %v363_v30  ;;  %v366_v38 = vadd.f32 %v365_v25, %v191_v35  ;;  %v381_v42 = vpop.f32.mrb[7].mxu0 }
  0xea   :  { %v450_v40 = vmax.f32 %v434_v33, 0.0  ;;  %v435_v41 = vadd.f32 %v901_v27, %v374_v34 }
  0xeb   :  { %v448_v43 = vmax.f32 %v432_v37, 0.0  ;;  %v433_v44 = vadd.f32 %v901_v27, %v366_v38 }
  0xec   :  { %v451_v45 = vmax.f32 %v435_v41, 0.0  ;;  %v466_v48 = vmin.f32 %v450_v40, 1.5 }
  0xed   :  { %v449_v46 = vmax.f32 %v433_v44, 0.0  ;;  %v718_v47 = vpop.f32.mrb[4].mxu1  ;;  %v464_v52 = vmin.f32 %v448_v43, 1.5 }
  0xee   :  { %v467_v49 = vmin.f32 %v451_v45, 1.5  ;;  %v387_v50 = vadd.f32 %v738_v32, %v718_v47  ;;  %v204_v51 = vpop.f32.mrb[5].mxu1  ;;  %v742_v56 = vpop.f32.mrb[8].mxu0 }
  0xef   :  { %v465_v53 = vmin.f32 %v449_v46, 1.5  ;;  %v379_v54 = vadd.f32 %v378_v36, %v204_v51  ;;  %v719_v55 = vpop.f32.mrb[6].mxu1  ;;  %v394_v61 = vpop.f32.mrb[9].mxu0 }
  0xf0   :  { %v643_v57 = vpack.c.bf16 %v467_v49, %v466_v48  ;;  %v438_v58 = vadd.f32 %v901_v27, %v387_v50  ;;  %v390_v59 = vadd.f32 %v739_v39, %v719_v55  ;;  %v207_v60 = vpop.f32.mrb[7].mxu1  ;;  %v743_v1 = vpop.f32.mrb[10].mxu0 }
  0xf1   :  { %v638_v62 = vpack.c.bf16 %v465_v53, %v464_v52  ;;  %v436_v63 = vadd.f32 %v901_v27, %v379_v54  ;;  %v382_v0 = vadd.f32 %v381_v42, %v207_v60  ;;  %v397_v4 = vpop.f32.mrb[11].mxu0 }
  0xf2   :  { %675 = vst [vmem:[%s948_s5 + $0x8] sm:$0xff] %v643_v57   ;;  %v454_v2 = vmax.f32 %v438_v58, 0.0  ;;  %v439_v3 = vadd.f32 %v901_v27, %v390_v59 }
  0xf3   :  { %639 = vst [vmem:[%s948_s5] sm:$0xff] %v638_v62   ;;  %v452_v5 = vmax.f32 %v436_v63, 0.0  ;;  %v437_v6 = vadd.f32 %v901_v27, %v382_v0 }
  0xf4   :  { %v455_v7 = vmax.f32 %v439_v3, 0.0  ;;  %v470_v10 = vmin.f32 %v454_v2, 1.5 }
  0xf5   :  { %v453_v8 = vmax.f32 %v437_v6, 0.0  ;;  %v722_v9 = vpop.f32.mrb[8].mxu1  ;;  %v468_v14 = vmin.f32 %v452_v5, 1.5 }
  0xf6   :  { %v471_v11 = vmin.f32 %v455_v7, 1.5  ;;  %v403_v12 = vadd.f32 %v742_v56, %v722_v9  ;;  %v220_v13 = vpop.f32.mrb[9].mxu1  ;;  %v746_v18 = vpop.f32.mrb[12].mxu0 }
  0xf7   :  { %v469_v15 = vmin.f32 %v453_v8, 1.5  ;;  %v395_v16 = vadd.f32 %v394_v61, %v220_v13  ;;  %v723_v17 = vpop.f32.mrb[10].mxu1  ;;  %v410_v23 = vpop.f32.mrb[13].mxu0 }
  0xf8   :  { %v653_v19 = vpack.c.bf16 %v471_v11, %v470_v10  ;;  %v442_v20 = vadd.f32 %v901_v27, %v403_v12  ;;  %v406_v21 = vadd.f32 %v743_v1, %v723_v17  ;;  %v223_v22 = vpop.f32.mrb[11].mxu1  ;;  %v747_v28 = vpop.f32.mrb[14].mxu0 }
  0xf9   :  { %v648_v24 = vpack.c.bf16 %v469_v15, %v468_v14  ;;  %v440_v25 = vadd.f32 %v901_v27, %v395_v16  ;;  %v398_v26 = vadd.f32 %v397_v4, %v223_v22  ;;  %v413_v31 = vpop.f32.mrb[15].mxu0 }
  0xfa   :  { %677 = vst [vmem:[%s948_s5 + $0x18] sm:$0xff] %v653_v19   ;;  %v458_v29 = vmax.f32 %v442_v20, 0.0  ;;  %v443_v30 = vadd.f32 %v901_v27, %v406_v21 }
  0xfb   :  { %676 = vst [vmem:[%s948_s5 + $0x10] sm:$0xff] %v648_v24   ;;  %v456_v32 = vmax.f32 %v440_v25, 0.0  ;;  %v441_v33 = vadd.f32 %v901_v27, %v398_v26 }
  0xfc   :  { %v459_v34 = vmax.f32 %v443_v30, 0.0  ;;  %v474_v37 = vmin.f32 %v458_v29, 1.5 }
  0xfd   :  { %v457_v35 = vmax.f32 %v441_v33, 0.0  ;;  %v726_v36 = vpop.f32.mrb[12].mxu1  ;;  %v472_v41 = vmin.f32 %v456_v32, 1.5 }
  0xfe   :  { %v475_v38 = vmin.f32 %v459_v34, 1.5  ;;  %v419_v39 = vadd.f32 %v746_v18, %v726_v36  ;;  %v236_v40 = vpop.f32.mrb[13].mxu1 }
  0xff   :  { %v473_v42 = vmin.f32 %v457_v35, 1.5  ;;  %v411_v43 = vadd.f32 %v410_v23, %v236_v40  ;;  %v727_v44 = vpop.f32.mrb[14].mxu1 }
 0x100   :  { %v663_v45 = vpack.c.bf16 %v475_v38, %v474_v37  ;;  %v446_v46 = vadd.f32 %v901_v27, %v419_v39  ;;  %v422_v47 = vadd.f32 %v747_v28, %v727_v44  ;;  %v239_v48 = vpop.f32.mrb[15].mxu1 }
 0x101   :  { %v658_v49 = vpack.c.bf16 %v473_v42, %v472_v41  ;;  %v444_v50 = vadd.f32 %v901_v27, %v411_v43  ;;  %v414_v51 = vadd.f32 %v413_v31, %v239_v48 }
 0x102   :  { %679 = vst [vmem:[%s948_s5 + $0x28] sm:$0xff] %v663_v45   ;;  %v462_v52 = vmax.f32 %v446_v46, 0.0  ;;  %v447_v53 = vadd.f32 %v901_v27, %v422_v47 }
 0x103   :  { %678 = vst [vmem:[%s948_s5 + $0x20] sm:$0xff] %v658_v49   ;;  %v460_v54 = vmax.f32 %v444_v50, 0.0  ;;  %v445_v55 = vadd.f32 %v901_v27, %v414_v51 }
 0x104   :  { %v463_v56 = vmax.f32 %v447_v53, 0.0  ;;  %v478_v58 = vmin.f32 %v462_v52, 1.5 }
 0x105   :  { %v461_v57 = vmax.f32 %v445_v55, 0.0  ;;  %v476_v60 = vmin.f32 %v460_v54, 1.5 }
 0x106   :  { %v479_v59 = vmin.f32 %v463_v56, 1.5 }
 0x107   :  { %v477_v61 = vmin.f32 %v461_v57, 1.5 }
 0x108   :  { %v673_v62 = vpack.c.bf16 %v479_v59, %v478_v58 }
 0x109   :  { %v668_v63 = vpack.c.bf16 %v477_v61, %v476_v60 }
 0x10a   :  { %681 = vst [vmem:[%s948_s5 + $0x38] sm:$0xff] %v673_v62  }
 0x10b   :  { %680 = vst [vmem:[%s948_s5 + $0x30] sm:$0xff] %v668_v63  }

// kernel: fwd.10
= control target key start
LH: loop header
LB: loop body
LE: loop exit
PB: predicated region body
PF: predicated region fallthrough
CT: control target
= control target key end

     0   :  { %s972_s12 = smov 0   ;;  %s974_s13 = smov 0   ;;  %s1102_s0 = inlined_call_operand.vmem [shape: bf16[2,10,8,96], index: 0, kind: input, shape index: {}]   ;;  %s1103_s1 = inlined_call_operand.vmem [shape: bf16[3,96,32], index: 1, kind: input, shape index: {}]   ;;  %s1104_s2 = inlined_call_operand.vmem [shape: f32[1,32], index: 2, kind: input, shape index: {}]   ;;  %s1105_s3 = inlined_call_operand.vmem [shape: bf16[2,8,8,32], index: 3, kind: output, shape index: {}]  }
   0x1   :  { %s976_s14 = smov 0   ;;  %s978_s15 = smov 0  }
   0x2   :  { %s980_s16 = smov 0  }
   0x3 LB: > { %s22_s17 = sadd.s32 1, %s942_s14  ;;  %s25_s18 = sadd.s32 1, %s946_s15  ;;  %s950_s16 = sphi %s980_s16, %s13_s16   ;;  %s946_s15 = sphi %s978_s15, %s1109_s15   ;;  %s942_s14 = sphi %s976_s14, %s1108_s14   ;;  %s938_s13 = sphi %s974_s13, %s1107_s13   ;;  %s934_s12 = sphi %s972_s12, %s1106_s12  }
   0x4   : > { %p23_p0 = scmp.ge.s32.totalorder %s22_s17, 2  ;;  %p688_p1 = scmp.ge.s32.totalorder %s950_s16, 1 }
   0x5   : > { %p151_p2 = scmp.lt.s32.totalorder %s950_s16, 5 }
   0x6   : > { %s1111_s17 = smov (%p23_p0, %s22_s17), 0  ;;  %s1113_s18 = smov (!%p23_p0, %s25_s18), %s946_s15 }
   0x7   : > { %p152_p3 = pnand %p688_p1, %p151_p2  ;;  %p27_p4 = scmp.ge.s32.totalorder %s1113_s18, 2 }
   0x8   : > { %v888_v0 = vld [vmem:[%s1103_s1] sm:$0xff] (!%p152_p3)   ;;  %p179_p5 = scmp.lt.s32.totalorder (!%p152_p3), %s938_s13, 1  ;;  %v889_v1 = vld [vmem:[%s1103_s1 + $0x8] sm:$0xff] (!%p152_p3)   ;;  %s764_s23 = sshll.u32 (!%p152_p3), %s934_s12, 4  ;;  %v890_v2 = vld [vmem:[%s1103_s1 + $0x10] sm:$0xff] (!%p152_p3)   ;;  %vm280_vm0 = vcmask (!%p152_p3), 785408  }
   0x9   : > { %s1115_s18 = smov (%p27_p4, %s1113_s18), 0  ;;  %155 = sbr.rel (%p152_p3) target bundleno = 284 (0x11c), region = 32 }
   0xa   : > { %807 = vmatprep.subr.bf16.mxu0 (!%p152_p3), %v888_v0  ;;  %v894_v3 = vld [vmem:[%s1103_s1 + $0x30] sm:$0xff] (!%p152_p3)   ;;  %v891_v4 = vld [vmem:[%s1103_s1 + $0x18] sm:$0xff] (!%p152_p3)   ;;  %v892_v7 = vld [vmem:[%s1103_s1 + $0x20] sm:$0xff] (!%p152_p3)   ;;  %s690_s22 = sshll.u32 (!%p152_p3), %s934_s12, 2  ;;  %vm585_vm1 = vcmask (!%p152_p3), 257024  }
   0xb   : > { %808 = vmatpush3.bf16.msra.mxu0 (!%p152_p3), %v888_v0  ;;  %791 = vmatprep.subr.bf16.mxu1 (!%p152_p3), %v894_v3  ;;  %v897_v6 = vld [vmem:[%s1103_s1 + $0x38] sm:$0xff] (!%p152_p3)   ;;  %v900_v8 = vld [vmem:[%s1103_s1 + $0x40] sm:$0xff] (!%p152_p3)   ;;  %v902_v9 = vld [vmem:[%s1103_s1 + $0x48] sm:$0xff] (!%p152_p3)   ;;  %p187_p6 = scmp.lt.s32.totalorder (!%p152_p3), %s690_s22, 7 }
   0xc   : > { %809 = vmatprep.subr.bf16.mxu0 (!%p152_p3), %v889_v1  ;;  %792 = vmatpush3.bf16.msra.mxu1 (!%p152_p3), %v894_v3  ;;  %v893_v10 = vld [vmem:[%s1103_s1 + $0x28] sm:$0xff] (!%p152_p3)   ;;  %v904_v11 = vld [vmem:[%s1103_s1 + $0x50] sm:$0xff] (!%p152_p3)   ;;  %v896_v13 = vld [vmem:[%s1103_s1 + $0x60] sm:$0xff] (!%p152_p3)  }
   0xd   : > { %793 = vmatprep.subr.bf16.mxu1 (!%p152_p3), %v897_v6  ;;  %v906_v15 = vld [vmem:[%s1103_s1 + $0x58] sm:$0xff] (!%p152_p3)   ;;  %v899_v17 = vld [vmem:[%s1103_s1 + $0x68] sm:$0xff] (!%p152_p3)   ;;  %v901_v18 = vld [vmem:[%s1103_s1 + $0x70] sm:$0xff] (!%p152_p3)  }
   0xe   : > { %v903_v20 = vld [vmem:[%s1103_s1 + $0x78] sm:$0xff] (!%p152_p3)   ;;  %v905_v21 = vld [vmem:[%s1103_s1 + $0x80] sm:$0xff] (!%p152_p3)   ;;  %v908_v22 = vld [vmem:[%s1103_s1 + $0x88] sm:$0xff] (!%p152_p3)  }
   0xf   : > { %810 = vmatpush3.bf16.msra.mxu0 (!%p152_p3), %v889_v1  ;;  %v761_v29 = vld [vmem:[%s1104_s2] ss:$0 sm:$0xff] (!%p152_p3) }
  0x10   : > { %s1117_s13 = smov (!%p179_p5, %s938_s13), 1  ;;  %811 = vmatprep.subr.bf16.mxu0 %v890_v2  ;;  %794 = vmatpush3.bf16.msra.mxu1 %v897_v6  ;;  %s1119_s22 = smov (!%p187_p6, %s690_s22), 7 }
  0x11   : > { %s847_s26 = smul.u32 40, %s1117_s13  ;;  %795 = vmatprep.subr.bf16.mxu1 %v900_v8 }
  0x13   : > { %s183_s4 = scalar_lea.vmem %s1102_s0, %s847_s26  ;;  %812 = vmatpush3.bf16.msra.mxu0 %v890_v2 }
  0x14   : > { %s1026_s7 = scalar_lea.vmem %s183_s4, %s764_s23  ;;  %813 = vmatprep.subr.bf16.mxu0 %v891_v4  ;;  %796 = vmatpush3.bf16.msra.mxu1 %v900_v8  ;;  %s691_s23 = sshll.u32 %s1117_s13, 3 }
  0x15   : > { %v895_v5 = vld [vmem:[%s1026_s7] sm:$0xff]   ;;  %797 = vmatprep.subr.bf16.mxu1 %v902_v9  ;;  %v898_v14 = vld [vmem:[%s1026_s7 + $0x8] sm:$0xff]   ;;  %v911_v23 = vld [vmem:[%s1026_s7 + $0x10] sm:$0xff]   ;;  %s190_s26 = sadd.s32 %s691_s23, %s1119_s22 }
  0x16   : > { %819 = vmatprep.mubr.msk.bf16.mxu0 %vm280_vm0, %v895_v5  ;;  %v907_v12 = vld [vmem:[%s1026_s7 + $0x4] sm:$0xff]   ;;  %v909_v19 = vld [vmem:[%s1026_s7 + $0xc] sm:$0xff]  }
  0x17   : > { %814 = vmatpush3.bf16.msra.mxu0 %v891_v4  ;;  %803 = vmatprep.mubr.msk.bf16.mxu1 %vm280_vm0, %v907_v12  ;;  %v910_v16 = vld [vmem:[%s1026_s7 + $0x8] sm:$0xff]   ;;  %s692_s7 = sshll.u32 %s190_s26, 2 }
  0x18   : > { %815 = vmatprep.subr.bf16.mxu0 %v892_v7  ;;  %798 = vmatpush3.bf16.msra.mxu1 %v902_v9  ;;  %s192_s27 = scalar_lea.vmem %s1105_s3, %s692_s7 }
  0x19   : > { %799 = vmatprep.subr.bf16.mxu1 %v904_v11 }
  0x1b   : > { %816 = vmatpush3.bf16.msra.mxu0 %v892_v7 }
  0x1c   : > { %817 = vmatprep.subr.bf16.mxu0 %v893_v10  ;;  %800 = vmatpush3.bf16.msra.mxu1 %v904_v11 }
  0x1d   : > { %801 = vmatprep.subr.bf16.mxu1 %v906_v15 }
  0x1f   : > { %818 = vmatpush3.bf16.msra.mxu0 %v893_v10 }
  0x20   : > { %823 = vmatprep.subr.bf16.mxu0 %v896_v13  ;;  %802 = vmatpush3.bf16.msra.mxu1 %v906_v15 }
  0x22   : > { %820 = vmatmul.mubr.msk.bf16.vlgmr.msra.gmra.mrb[0].mxu0 %vm280_vm0, %v898_v14 }
  0x23   : > { %824 = vmatpush3.bf16.msra.mxu0 %v896_v13  ;;  %835 = vmatprep.mubr.msk.bf16.mxu0 %vm280_vm0, %v910_v16 }
  0x24   : > { %825 = vmatprep.subr.bf16.mxu0 %v899_v17  ;;  %804 = vmatmul.mubr.msk.bf16.vlgmr.msra.gmra.mrb[0].mxu1 %vm280_vm0, %v909_v19 }
  0x27   : > { %826 = vmatpush3.bf16.msra.mxu0 %v899_v17 }
  0x28   : > { %827 = vmatprep.subr.bf16.mxu0 %v901_v18 }
  0x2b   : > { %828 = vmatpush3.bf16.msra.mxu0 %v901_v18 }
  0x2c   : > { %829 = vmatprep.subr.bf16.mxu0 %v903_v20 }
  0x2f   : > { %830 = vmatpush3.bf16.msra.mxu0 %v903_v20 }
  0x30   : > { %831 = vmatprep.subr.bf16.mxu0 %v905_v21 }
  0x33   : > { %832 = vmatpush3.bf16.msra.mxu0 %v905_v21 }
  0x34   : > { %833 = vmatprep.subr.bf16.mxu0 %v908_v22 }
  0x37   : > { %834 = vmatpush3.bf16.msra.mxu0 %v908_v22 }
  0x3a   : > { %836 = vmatmul.mubr.msk.bf16.vlgmr.msra.gmra.mrb[0].mxu0 %vm280_vm0, %v911_v23 }
  0xf7   : > { %v805_v24 = vpop.f32.mrb[0].mxu1 }
  0xf8   : > { %v321_v25 = vpop.f32.mrb[1].mxu1 }
  0xf9   : > { %v806_v26 = vpop.f32.mrb[2].mxu1 }
  0xfa   : > { %v324_v27 = vpop.f32.mrb[3].mxu1 }
 0x10d   : > { %v837_v28 = vpop.f32.mrb[0].mxu0 }
 0x10e   : > { %v839_v30 = vadd.f32 %v837_v28, %v805_v24  ;;  %v543_v31 = vpop.f32.mrb[1].mxu0 }
 0x10f   : > { %v840_v32 = vadd.f32 %v543_v31, %v321_v25  ;;  %v838_v33 = vpop.f32.mrb[2].mxu0 }
 0x110   : > { %v571_v34 = vadd.f32 %v839_v30, %v761_v29  ;;  %v841_v35 = vadd.f32 %v838_v33, %v806_v26  ;;  %v546_v36 = vpop.f32.mrb[3].mxu0 }
 0x111   : > { %v569_v37 = vadd.f32 %v840_v32, %v761_v29  ;;  %v842_v38 = vadd.f32 %v546_v36, %v324_v27 }
 0x112   : > { %v575_v39 = vmax.f32 %v571_v34, 0.0  ;;  %v572_v40 = vadd.f32 %v841_v35, %v761_v29 }
 0x113   : > { %v573_v41 = vmax.f32 %v569_v37, 0.0  ;;  %v570_v42 = vadd.f32 %v842_v38, %v761_v29 }
 0x114   : > { %v579_v43 = vmin.f32 %v575_v39, 1.5  ;;  %v576_v44 = vmax.f32 %v572_v40, 0.0 }
 0x115   : > { %v577_v45 = vmin.f32 %v573_v41, 1.5  ;;  %v574_v46 = vmax.f32 %v570_v42, 0.0 }
 0x116   : > { %v583_v47 = vpack.c.bf16 %v579_v43, %v579_v43  ;;  %v580_v48 = vmin.f32 %v576_v44, 1.5 }
 0x117   : > { %v581_v49 = vpack.c.bf16 %v577_v45, %v577_v45  ;;  %v578_v50 = vmin.f32 %v574_v46, 1.5 }
 0x118   : > { %588 = vst.msk [vmem:[%s192_s27 + $0x8] sm:$0xf] %vm585_vm1, %v583_v47  ;;  %v584_v51 = vpack.c.bf16 %v580_v48, %v580_v48 }
 0x119   : > { %586 = vst.msk [vmem:[%s192_s27] sm:$0xf] %vm585_vm1, %v581_v49  ;;  %v582_v52 = vpack.c.bf16 %v578_v50, %v578_v50 }
 0x11a   : > { %589 = vst.msk [vmem:[%s192_s27 + $0xc] sm:$0xf] %vm585_vm1, %v584_v51 }
 0x11b   : > { %587 = vst.msk [vmem:[%s192_s27 + $0x4] sm:$0xf] %vm585_vm1, %v582_v52 }
 0x11c PF: > { %s13_s16 = sadd.s32 1, %s950_s16   ;;  %s1106_s12 = smov %s942_s14 }
 0x11d   : > { %p10_p7 = scmp.ge.s32.totalorder %s13_s16, 6   ;;  %s1107_s13 = smov %s946_s15 }
 0x11e   : > { %s1108_s14 = smov %s1111_s17  ;;  %s1109_s15 = smov %s1115_s18 }
 0x11f   :  { %12 = sbr.rel (!%p10_p7) target bundleno = 3 (0x3), region = 67 }

// kernel: fwd.11
= control target key start
LH: loop header
LB: loop body
LE: loop exit
PB: predicated region body
PF: predicated region fallthrough
CT: control target
= control target key end

     0   :  { %vm98_vm0 = vcmask 261120   ;;  %s751_s0 = inlined_call_operand.vmem [shape: bf16[128,32], index: 0, kind: input, shape index: {}]   ;;  %s752_s1 = inlined_call_operand.vmem [shape: bf16[32,128], index: 1, kind: input, shape index: {}]   ;;  %s753_s2 = inlined_call_operand.vmem [shape: f32[1,128], index: 2, kind: input, shape index: {}]   ;;  %s754_s3 = inlined_call_operand.vmem [shape: bf16[128,128], index: 3, kind: input, shape index: {}]   ;;  %s755_s4 = inlined_call_operand.hbm [shape: bf16[128,128], index: 4, kind: output, shape index: {}]  }
   0x1   :  { %v570_v0 = vld [vmem:[%s752_s1] sm:$0xff]   ;;  %v571_v1 = vld [vmem:[%s752_s1 + $0x8] sm:$0xff]   ;;  %v576_v6 = vld [vmem:[%s751_s0 + $0x10] sm:$0xff]  }
   0x2   :  { %543 = vmatprep.subr.bf16.mxu0 %v570_v0  ;;  %563 = vmatprep.subr.bf16.mxu1 %v570_v0  ;;  %v572_v2 = vld [vmem:[%s751_s0] sm:$0xff]   ;;  %v574_v4 = vld [vmem:[%s751_s0 + $0x8] sm:$0xff]   ;;  %v577_v7 = vld [vmem:[%s751_s0 + $0x30] sm:$0xff]  }
   0x3   :  { %544 = vmatpush3.bf16.msra.mxu0 %v570_v0  ;;  %565 = vmatpush3.bf16.msra.mxu1 %v570_v0  ;;  %v573_v3 = vld [vmem:[%s751_s0 + $0x20] sm:$0xff]   ;;  %v575_v5 = vld [vmem:[%s751_s0 + $0x28] sm:$0xff]  }
   0x4   :  { %545 = vmatprep.subr.bf16.mxu0 %v571_v1  ;;  %564 = vmatprep.subr.bf16.mxu1 %v571_v1 }
   0x5   :  { %547 = vmatprep.mubr.msk.bf16.mxu0 %vm98_vm0, %v572_v2  ;;  %555 = vmatprep.mubr.msk.bf16.mxu1 %vm98_vm0, %v573_v3 }
   0x7   :  { %546 = vmatpush3.bf16.msra.mxu0 %v571_v1  ;;  %566 = vmatpush3.bf16.msra.mxu1 %v571_v1 }
   0xa   :  { %548 = vmatmul.mubr.msk.bf16.vlgmr.msra.gmra.mrb[0].mxu0 %vm98_vm0, %v574_v4  ;;  %556 = vmatmul.mubr.msk.bf16.vlgmr.msra.gmra.mrb[0].mxu1 %vm98_vm0, %v575_v5 }
   0xb   :  { %9 = vsyncpa [#allocation3], 0  ;;  %551 = vmatprep.mubr.msk.bf16.mxu0 %vm98_vm0, %v576_v6  ;;  %559 = vmatprep.mubr.msk.bf16.mxu1 %vm98_vm0, %v577_v7  ;;  %v578_v8 = vld [vmem:[%s751_s0 + $0x18] sm:$0xff]   ;;  %v519_v10 = vld [vmem:[%s754_s3 + $0x8] sm:$0xff]  }
   0xc   :  { %v579_v9 = vld [vmem:[%s751_s0 + $0x38] sm:$0xff]   ;;  %v523_v11 = vld [vmem:[%s754_s3 + $0x28] sm:$0xff]   ;;  %v448_v12 = vld [vmem:[%s754_s3] sm:$0xff]   ;;  %v453_v19 = vunpack.c.l.bf16 %v519_v10  ;;  %v454_v23 = vunpack.c.h.bf16 %v519_v10 }
   0xd   :  { %v522_v13 = vld [vmem:[%s754_s3 + $0x20] sm:$0xff]   ;;  %v685_v14 = vld [vmem:[%s754_s3 + $0x18] sm:$0xff]   ;;  %v695_v16 = vld [vmem:[%s754_s3 + $0x10] sm:$0xff]   ;;  %v469_v20 = vunpack.c.l.bf16 %v523_v11  ;;  %v449_v21 = vunpack.c.l.bf16 %v448_v12  ;;  %v470_v24 = vunpack.c.h.bf16 %v523_v11  ;;  %v450_v25 = vunpack.c.h.bf16 %v448_v12 }
   0xe   :  { %v690_v15 = vld [vmem:[%s754_s3 + $0x38] sm:$0xff]   ;;  %v700_v17 = vld [vmem:[%s754_s3 + $0x30] sm:$0xff]   ;;  %v705_v18 = vld [vmem:[%s753_s2] ss:$0 sm:$0xff]  ;;  %v465_v22 = vunpack.c.l.bf16 %v522_v13  ;;  %v466_v26 = vunpack.c.h.bf16 %v522_v13  ;;  %v461_v29 = vunpack.c.l.bf16 %v685_v14  ;;  %v457_v31 = vunpack.c.l.bf16 %v695_v16  ;;  %s604_s2 = smov [#allocation2]  }
   0xf   :  { %v477_v30 = vunpack.c.l.bf16 %v690_v15  ;;  %v473_v32 = vunpack.c.l.bf16 %v700_v17  ;;  %v462_v37 = vunpack.c.h.bf16 %v685_v14  ;;  %v478_v38 = vunpack.c.h.bf16 %v690_v15  ;;  %s385_s3 = sshll.u32 %s604_s2, 4  ;;  %s386_s3 = int_to_ptr.vmem [resolvable:$true] %s385_s3 }
  0x10   :  { %v458_v43 = vunpack.c.h.bf16 %v695_v16  ;;  %v474_v44 = vunpack.c.h.bf16 %v700_v17  ;;  %s580_s1 = scalar_lea.vmem %s386_s3, 1024  ;;  %p585_p1 = scmp.lt.s32.totalorder %s386_s3, %s386_s3 }
  0x11   :  { %p581_p0 = scmp.ne.s32.totalorder %s386_s3, %s580_s1  ;;  %p586_p2 = scmp.lt.s32.totalorder %s580_s1, %s580_s1 }
  0x12   :  { %552 = vmatmul.mubr.msk.bf16.gmra.mrb[4].mxu0 %vm98_vm0, %v578_v8  ;;  %560 = vmatmul.mubr.msk.bf16.gmra.mrb[4].mxu1 %vm98_vm0, %v579_v9 }
  0x13   :  { %p587_p3 = por %p586_p2, %p585_p1 }
  0x15   :  { %p588_p4 = pnand %p587_p3, %p581_p0 }
  0xdd   :  { %v549_v27 = vpop.f32.mrb[0].mxu0  ;;  %v557_v28 = vpop.f32.mrb[0].mxu1 }
  0xde   :  { %v166_v33 = vadd.f32 %v549_v27, %v705_v18  ;;  %v198_v34 = vadd.f32 %v557_v28, %v705_v18  ;;  %v157_v35 = vpop.f32.mrb[1].mxu0  ;;  %v189_v36 = vpop.f32.mrb[1].mxu1 }
  0xdf   :  { %v158_v39 = vadd.f32 %v705_v18, %v157_v35  ;;  %v190_v40 = vadd.f32 %v705_v18, %v189_v36  ;;  %v550_v41 = vpop.f32.mrb[2].mxu0  ;;  %v558_v42 = vpop.f32.mrb[2].mxu1 }
  0xe0   :  { %v254_v45 = vadd.f32 %v453_v19, %v166_v33  ;;  %v262_v46 = vadd.f32 %v469_v20, %v198_v34  ;;  %v169_v47 = vadd.f32 %v550_v41, %v705_v18  ;;  %v201_v48 = vadd.f32 %v558_v42, %v705_v18  ;;  %v160_v49 = vpop.f32.mrb[3].mxu0  ;;  %v192_v50 = vpop.f32.mrb[3].mxu1 }
  0xe1   :  { %v252_v51 = vadd.f32 %v449_v21, %v158_v39  ;;  %v260_v52 = vadd.f32 %v465_v22, %v190_v40  ;;  %v161_v53 = vadd.f32 %v705_v18, %v160_v49  ;;  %v193_v54 = vadd.f32 %v705_v18, %v192_v50 }
  0xe2   :  { %v270_v55 = vmax.f32 %v254_v45, 0.0  ;;  %v278_v56 = vmax.f32 %v262_v46, 0.0  ;;  %v255_v57 = vadd.f32 %v454_v23, %v169_v47  ;;  %v263_v58 = vadd.f32 %v470_v24, %v201_v48 }
  0xe3   :  { %v268_v59 = vmax.f32 %v252_v51, 0.0  ;;  %v276_v60 = vmax.f32 %v260_v52, 0.0  ;;  %v253_v61 = vadd.f32 %v450_v25, %v161_v53  ;;  %v261_v62 = vadd.f32 %v466_v26, %v193_v54 }
  0xe4   :  { %v286_v63 = vmin.f32 %v270_v55, 1.5  ;;  %v294_v0 = vmin.f32 %v278_v56, 1.5  ;;  %v271_v1 = vmax.f32 %v255_v57, 0.0  ;;  %v279_v2 = vmax.f32 %v263_v58, 0.0 }
  0xe5   :  { %v284_v3 = vmin.f32 %v268_v59, 1.5  ;;  %v292_v4 = vmin.f32 %v276_v60, 1.5  ;;  %v269_v5 = vmax.f32 %v253_v61, 0.0  ;;  %v277_v6 = vmax.f32 %v261_v62, 0.0  ;;  %v553_v7 = vpop.f32.mrb[4].mxu0  ;;  %v561_v8 = vpop.f32.mrb[4].mxu1 }
  0xe6   :  { %v287_v9 = vmin.f32 %v271_v1, 1.5  ;;  %v295_v10 = vmin.f32 %v279_v2, 1.5  ;;  %v182_v11 = vadd.f32 %v553_v7, %v705_v18  ;;  %v214_v12 = vadd.f32 %v561_v8, %v705_v18  ;;  %v173_v13 = vpop.f32.mrb[5].mxu0  ;;  %v205_v19 = vpop.f32.mrb[5].mxu1 }
  0xe7   :  { %v285_v20 = vmin.f32 %v269_v5, 1.5  ;;  %v293_v21 = vmin.f32 %v277_v6, 1.5  ;;  %v174_v22 = vadd.f32 %v705_v18, %v173_v13  ;;  %v206_v23 = vadd.f32 %v705_v18, %v205_v19  ;;  %v554_v24 = vpop.f32.mrb[6].mxu0  ;;  %v562_v25 = vpop.f32.mrb[6].mxu1 }
  0xe8   :  { %v487_v26 = vpack.c.bf16 %v287_v9, %v286_v63  ;;  %v507_v27 = vpack.c.bf16 %v295_v10, %v294_v0  ;;  %v258_v28 = vadd.f32 %v461_v29, %v182_v11  ;;  %v266_v33 = vadd.f32 %v477_v30, %v214_v12  ;;  %v176_v34 = vpop.f32.mrb[7].mxu0  ;;  %v208_v35 = vpop.f32.mrb[7].mxu1 }
  0xe9   :  { %v482_v36 = vpack.c.bf16 %v285_v20, %v284_v3  ;;  %v502_v39 = vpack.c.bf16 %v293_v21, %v292_v4  ;;  %v256_v40 = vadd.f32 %v457_v31, %v174_v22  ;;  %v264_v41 = vadd.f32 %v473_v32, %v206_v23 }
  0xea   :  { %526 = vst [vmem:[#allocation2 + $0x8] sm:$0xff] %v487_v26   ;;  %530 = vst [vmem:[#allocation2 + $0x28] sm:$0xff] %v507_v27   ;;  %v185_v42 = vadd.f32 %v554_v24, %v705_v18  ;;  %v217_v45 = vadd.f32 %v562_v25, %v705_v18  ;;  %v177_v46 = vadd.f32 %v705_v18, %v176_v34  ;;  %v274_v29 = vmax.f32 %v258_v28, 0.0 }
  0xeb   :  { %483 = vst [vmem:[#allocation2] sm:$0xff] %v482_v36   ;;  %529 = vst [vmem:[#allocation2 + $0x20] sm:$0xff] %v502_v39   ;;  %v209_v47 = vadd.f32 %v705_v18, %v208_v35  ;;  %v282_v30 = vmax.f32 %v266_v33, 0.0  ;;  %v272_v32 = vmax.f32 %v256_v40, 0.0  ;;  %v280_v49 = vmax.f32 %v264_v41, 0.0 }
  0xec   :  { %v259_v48 = vadd.f32 %v462_v37, %v185_v42  ;;  %v267_v31 = vadd.f32 %v478_v38, %v217_v45  ;;  %v257_v50 = vadd.f32 %v458_v43, %v177_v46  ;;  %v290_v55 = vmin.f32 %v274_v29, 1.5 }
  0xed   :  { %v265_v51 = vadd.f32 %v474_v44, %v209_v47  ;;  %v298_v14 = vmin.f32 %v282_v30, 1.5  ;;  %v288_v15 = vmin.f32 %v272_v32, 1.5  ;;  %v296_v38 = vmin.f32 %v280_v49, 1.5 }
  0xee   :  { %v275_v52 = vmax.f32 %v259_v48, 0.0  ;;  %v283_v53 = vmax.f32 %v267_v31, 0.0  ;;  %v273_v54 = vmax.f32 %v257_v50, 0.0 }
  0xef   :  { %v281_v18 = vmax.f32 %v265_v51, 0.0 }
  0xf0   :  { %v291_v37 = vmin.f32 %v275_v52, 1.5  ;;  %v299_v56 = vmin.f32 %v283_v53, 1.5  ;;  %v289_v57 = vmin.f32 %v273_v54, 1.5 }
  0xf1   :  { %v297_v58 = vmin.f32 %v281_v18, 1.5 }
  0xf2   :  { %v497_v59 = vpack.c.bf16 %v291_v37, %v290_v55  ;;  %v517_v16 = vpack.c.bf16 %v299_v56, %v298_v14  ;;  %v492_v43 = vpack.c.bf16 %v289_v57, %v288_v15 }
  0xf3   :  { %v512_v17 = vpack.c.bf16 %v297_v58, %v296_v38 }
  0xf4   :  { %528 = vst [vmem:[#allocation2 + $0x18] sm:$0xff] %v497_v59   ;;  %532 = vst [vmem:[#allocation2 + $0x38] sm:$0xff] %v517_v16  }
  0xf5   :  { %527 = vst [vmem:[#allocation2 + $0x10] sm:$0xff] %v492_v43   ;;  %531 = vst [vmem:[#allocation2 + $0x30] sm:$0xff] %v512_v17  }
  0xf6   :  { %591 = shalt.err (!%p588_p4)
}
  0xf7   :  { %s592_s27 = scalar_lea.hbm %s755_s4, 1024 }
  0xf8   :  { %p593_p5 = scmp.ne.s32.totalorder %s755_s4, %s592_s27  ;;  %p596_p6 = scmp.lt.u32.totalorder %s592_s27, %s755_s4 }
  0xfa   :  { %p598_p7 = pnand %p596_p6, %p593_p5 }
  0xfc   :  { %601 = shalt.err (!%p598_p7)
}
  0xfd   :  { %s605_s6 = smov 64   ;;  %s606_s7 = smov 4  }
  0xfe   :  { %391 = dma.vmem_to_hbm [thread:$0]  %s386_s3, 1024, %s755_s4, [#allocation3], %s605_s6, %s605_s6, %s606_s7  }
  0xff   :  { %602 = dma.done.wait [#allocation3], 1024  }
 0x100   :  { %603 = vsyncadd [#allocation3], 4294966272 }
 0x101   :  { %395 = vsyncpa [#allocation3], 1 }

</bundles_post_ra>
